<compile_context>
chip_gen: v7x
topology: tpu7x:2x2x1
jax: 0.10.0
libtpu: 0.0.40
codegen_flags: <defaults>
</compile_context>

<pallas_src>
import jax
import jax.numpy as jnp
from jax import lax
from jax.experimental import pallas as pl
from jax.experimental.pallas import tpu as pltpu

BN_EPS = 1e-5
NORM_EPS = 1e-12


def _round_up(x, m):
    return (x + m - 1) // m * m


def _full_spec(arr):
    """BlockSpec covering the full (2-D) array; fetched once, resident."""
    assert arr.ndim == 2
    return pl.BlockSpec(arr.shape, lambda p, t: (0, 0))


def _make_kernel(b_real, tile_b, need_mask, compute_dtype):
    """Build the kernel closure (b_real/tile_b/need_mask are trace-time constants)."""

    def kernel(x_ref, w1_ref, b1_ref, g1_ref, be1_ref,
               w2_ref, b2_ref, g2_ref, be2_ref,
               w3_ref, b3_ref, o_ref,
               s1_ref, ss1_ref, s2_ref, ss2_ref):
        p = pl.program_id(0)   # phase: 0 = BN1 stats, 1 = BN2 stats, 2 = output
        t = pl.program_id(1)   # batch tile

        inv_b = jnp.float32(1.0 / b_real)

        if need_mask:
            rows = t * tile_b + lax.broadcasted_iota(jnp.int32, (tile_b, 1), 0)
            valid = rows < b_real          # [TB, 1] bool
        else:
            valid = None

        def masked(h):
            return h if valid is None else jnp.where(valid, h, 0.0)

        def layer1():
            xv = x_ref[...].astype(compute_dtype)
            h = jnp.dot(xv, w1_ref[...], preferred_element_type=jnp.float32)
            return jnp.maximum(h + b1_ref[...], 0.0)

        def layer2(y1):
            h = jnp.dot(y1.astype(compute_dtype), w2_ref[...],
                        preferred_element_type=jnp.float32)
            return jnp.maximum(h + b2_ref[...], 0.0)

        def bn_coeffs(s_ref, ss_ref, g_ref, be_ref):
            # one-pass stats: mu = s/B, var = ss/B - mu^2 (biased, as PyTorch BN)
            mu = s_ref[...] * inv_b
            var = jnp.maximum(ss_ref[...] * inv_b - mu * mu, 0.0)
            a = g_ref[...] * lax.rsqrt(var + BN_EPS)
            c = be_ref[...] - mu * a
            return a, c

        # ---------------- phase 0: BN1 statistics ----------------
        @pl.when(p == 0)
        def _():
            @pl.when(t == 0)
            def _():
                s1_ref[...] = jnp.zeros_like(s1_ref)
                ss1_ref[...] = jnp.zeros_like(ss1_ref)

            h1 = masked(layer1())
            s1_ref[...] += jnp.sum(h1, axis=0, keepdims=True)
            ss1_ref[...] += jnp.sum(h1 * h1, axis=0, keepdims=True)

        # ---------------- phase 1: BN2 statistics ----------------
        @pl.when(p == 1)
        def _():
            @pl.when(t == 0)
            def _():
                s2_ref[...] = jnp.zeros_like(s2_ref)
                ss2_ref[...] = jnp.zeros_like(ss2_ref)

            a1, c1 = bn_coeffs(s1_ref, ss1_ref, g1_ref, be1_ref)
            y1 = layer1() * a1 + c1
            h2 = masked(layer2(y1))
            s2_ref[...] += jnp.sum(h2, axis=0, keepdims=True)
            ss2_ref[...] += jnp.sum(h2 * h2, axis=0, keepdims=True)

        # ---------------- phase 2: full forward + normalize ----------------
        @pl.when(p == 2)
        def _():
            a1, c1 = bn_coeffs(s1_ref, ss1_ref, g1_ref, be1_ref)
            y1 = layer1() * a1 + c1
            a2, c2 = bn_coeffs(s2_ref, ss2_ref, g2_ref, be2_ref)
            y2 = layer2(y1) * a2 + c2
            z = jnp.dot(y2.astype(compute_dtype), w3_ref[...],
                        preferred_element_type=jnp.float32) + b3_ref[...]
            # L2 normalize (dim=1).  Padded output lanes are exactly zero, so the
            # lane-reduction over 128 equals the sum over the true embed_dim.
            # max(sqrt(s), eps) == sqrt(max(s, eps^2))  ->  rsqrt * mul (no divide).
            sq = jnp.sum(z * z, axis=1, keepdims=True)
            inv_norm = lax.rsqrt(jnp.maximum(sq, NORM_EPS * NORM_EPS))
            o_ref[...] = (z * inv_norm).astype(o_ref.dtype)

    return kernel


def supcon_encoder_forward(x, params, *, tile_b=128, compute_dtype=jnp.bfloat16):
    """x: [B, input_dim] float32.  params: dict of weights.
    Linear weights are stored transposed: [in_features, out_features]."""
    B, in_dim = x.shape
    hidden = params["w1"].shape[1]
    embed = params["w3"].shape[1]
    out_pad = _round_up(embed, 128)            # lane-dense output width

    tb = _round_up(min(tile_b, _round_up(B, 8)), 8)
    b_pad = _round_up(B, tb)
    num_tiles = b_pad // tb
    need_mask = (b_pad != B)

    # Pad batch rows with zeros (masked out of BN statistics inside the kernel).
    x_pad = x.astype(jnp.float32)
    if need_mask:
        x_pad = jnp.zeros((b_pad, in_dim), jnp.float32).at[:B].set(x_pad)

    # bf16 (or f32) weights; third linear zero-padded to a lane-dense 128 width.
    w1 = params["w1"].astype(compute_dtype)
    w2 = params["w2"].astype(compute_dtype)
    w3 = jnp.zeros((hidden, out_pad), jnp.float32).at[:, :embed].set(
        params["w3"]).astype(compute_dtype)
    b3 = jnp.zeros((1, out_pad), jnp.float32).at[:, :embed].set(params["b3"])
    b1 = params["b1"].astype(jnp.float32)
    b2 = params["b2"].astype(jnp.float32)
    g1 = params["g1"].astype(jnp.float32)
    be1 = params["be1"].astype(jnp.float32)
    g2 = params["g2"].astype(jnp.float32)
    be2 = params["be2"].astype(jnp.float32)

    args = (x_pad, w1, b1, g1, be1, w2, b2, g2, be2, w3, b3)

    in_specs = [pl.BlockSpec((tb, in_dim), lambda p, t: (t, 0))]
    in_specs += [_full_spec(a) for a in args[1:]]
    out_spec = pl.BlockSpec((tb, out_pad), lambda p, t: (t, 0))

    grid_spec = pltpu.PrefetchScalarGridSpec(
        num_scalar_prefetch=0,
        grid=(3, num_tiles),                    # phase (slow) x batch-tile (fast)
        in_specs=in_specs,
        out_specs=out_spec,
        scratch_shapes=[pltpu.VMEM((1, hidden), jnp.float32)] * 4,  # s1,ss1,s2,ss2
    )

    w_bytes = (in_dim * hidden + hidden * hidden + hidden * out_pad) \
        * jnp.dtype(compute_dtype).itemsize
    cost = pl.CostEstimate(
        flops=2 * b_pad * (3 * in_dim * hidden + 2 * hidden * hidden
                           + hidden * out_pad),
        transcendentals=b_pad + 6 * hidden * num_tiles,
        bytes_accessed=3 * b_pad * in_dim * 4 + w_bytes
        + 3 * b_pad * out_pad * 4 + 10 * hidden * 4,
    )

    out = pl.pallas_call(
        _make_kernel(B, tb, need_mask, compute_dtype),
        out_shape=jax.ShapeDtypeStruct((b_pad, out_pad), jnp.float32),
        grid_spec=grid_spec,
        compiler_params=pltpu.CompilerParams(
            # Both axes 'arbitrary': phases are sequential and the BN-stat scratch
            # accumulation must see every batch tile on the same core.
            dimension_semantics=("arbitrary", "arbitrary"),
            vmem_limit_bytes=32 * 1024 * 1024,
        ),
        cost_estimate=cost,
    )(*args)

    return out[:B, :embed]


def init_params(key, input_dim=32, hidden=128, embed_dim=64):
    """Deterministic synthetic parameters mimicking PyTorch Linear/BatchNorm shapes.
    Linear weights are stored transposed: [in_features, out_features]."""
    ks = jax.random.split(key, 8)

    def lin(kw, kb, fan_in, fan_out):
        bound = 1.0 / jnp.sqrt(fan_in)
        w = jax.random.uniform(kw, (fan_in, fan_out), jnp.float32, -bound, bound)
        b = jax.random.uniform(kb, (1, fan_out), jnp.float32, -bound, bound)
        return w, b

    w1, b1 = lin(ks[0], ks[1], input_dim, hidden)
    w2, b2 = lin(ks[2], ks[3], hidden, hidden)
    w3, b3 = lin(ks[4], ks[5], hidden, embed_dim)

    g1 = 1.0 + 0.1 * jax.random.normal(ks[6], (1, hidden), jnp.float32)
    be1 = 0.1 * jax.random.normal(ks[7], (1, hidden), jnp.float32)
    g2 = jnp.ones((1, hidden), jnp.float32)
    be2 = jnp.zeros((1, hidden), jnp.float32)

    return dict(w1=w1, b1=b1, g1=g1, be1=be1,
                w2=w2, b2=b2, g2=g2, be2=be2,
                w3=w3, b3=b3)


def reference_forward(x, p):
    """Pure-JAX f32 reference implementing the PyTorch training-mode semantics."""
    h1 = jnp.maximum(x @ p["w1"] + p["b1"], 0.0)
    mu, var = jnp.mean(h1, 0, keepdims=True), jnp.var(h1, 0, keepdims=True)
    y1 = (h1 - mu) / jnp.sqrt(var + BN_EPS) * p["g1"] + p["be1"]
    h2 = jnp.maximum(y1 @ p["w2"] + p["b2"], 0.0)
    mu, var = jnp.mean(h2, 0, keepdims=True), jnp.var(h2, 0, keepdims=True)
    y2 = (h2 - mu) / jnp.sqrt(var + BN_EPS) * p["g2"] + p["be2"]
    z = y2 @ p["w3"] + p["b3"]
    n = jnp.maximum(jnp.linalg.norm(z, axis=1, keepdims=True), NORM_EPS)
    return z / n


if __name__ == "__main__":
    key = jax.random.PRNGKey(0)
    k_x, k_p = jax.random.split(key)

    # B=200 deliberately not a multiple of the 128-row batch tile: exercises the
    # multi-tile two-pass BN path *and* the padded-row masking.
    B, INPUT_DIM, EMBED_DIM = 200, 32, 64
    x = jax.random.normal(k_x, (B, INPUT_DIM), jnp.float32)
    params = init_params(k_p, input_dim=INPUT_DIM, hidden=128, embed_dim=EMBED_DIM)

    ref = reference_forward(x, params)

    # 1) Strict structural check with f32 matmuls (tiling / two-pass BN / masking
    #    / padded lane-dense output / rsqrt epilogue all exercised).
    out_f32 = jax.block_until_ready(
        supcon_encoder_forward(x, params, tile_b=128, compute_dtype=jnp.float32))
    assert out_f32.shape == (B, EMBED_DIM)
    assert jnp.allclose(out_f32, ref, atol=5e-4, rtol=5e-4), "f32 kernel mismatch"
    assert jnp.allclose(jnp.linalg.norm(out_f32, axis=1), 1.0, atol=1e-4)

    # 2) Production bf16-MXU path (looser tolerance reflects bf16 matmul inputs).
    out_bf16 = jax.block_until_ready(
        supcon_encoder_forward(x, params, tile_b=128, compute_dtype=jnp.bfloat16))
    assert out_bf16.shape == (B, EMBED_DIM)
    assert jnp.allclose(out_bf16, ref, atol=3e-2), "bf16 kernel mismatch"
    assert jnp.allclose(jnp.linalg.norm(out_bf16, axis=1), 1.0, atol=1e-3)
    cos = jnp.sum(out_bf16 * ref, axis=1)
    assert float(jnp.min(cos)) > 0.999, "bf16 kernel: cosine similarity too low"

    print("KERNEL_OK")
</pallas_src>

<mosaic_0001>
module attributes {stable_mosaic.version = 11 : i64} {
  func.func @kernel(%arg0: i32, %arg1: i32, %arg2: memref<128x32xf32, #tpu.memory_space<vmem>>, %arg3: memref<32x128xf32, #tpu.memory_space<vmem>>, %arg4: memref<1x128xf32, #tpu.memory_space<vmem>>, %arg5: memref<1x128xf32, #tpu.memory_space<vmem>>, %arg6: memref<1x128xf32, #tpu.memory_space<vmem>>, %arg7: memref<128x128xf32, #tpu.memory_space<vmem>>, %arg8: memref<1x128xf32, #tpu.memory_space<vmem>>, %arg9: memref<1x128xf32, #tpu.memory_space<vmem>>, %arg10: memref<1x128xf32, #tpu.memory_space<vmem>>, %arg11: memref<128x128xf32, #tpu.memory_space<vmem>>, %arg12: memref<1x128xf32, #tpu.memory_space<vmem>>, %arg13: memref<128x128xf32, #tpu.memory_space<vmem>>, %arg14: memref<1x128xf32, #tpu.memory_space<vmem>>, %arg15: memref<1x128xf32, #tpu.memory_space<vmem>>, %arg16: memref<1x128xf32, #tpu.memory_space<vmem>>, %arg17: memref<1x128xf32, #tpu.memory_space<vmem>>) attributes {dimension_semantics = [#tpu.dimension_semantics<arbitrary>, #tpu.dimension_semantics<arbitrary>], iteration_bounds = array<i64: 3, 2>, scalar_prefetch = 0 : i64, scratch_operands = 4 : i64, tpu.core_type = #tpu.core_type<tc>, window_params = [{transform_indices = @transform_0, window_bounds = array<i64: 128, 32>}, {pipeline_mode = #tpu.pipeline_mode<synchronous>, transform_indices = @transform_1, window_bounds = array<i64: 32, 128>}, {pipeline_mode = #tpu.pipeline_mode<synchronous>, transform_indices = @transform_2, window_bounds = array<i64: 1, 128>}, {pipeline_mode = #tpu.pipeline_mode<synchronous>, transform_indices = @transform_3, window_bounds = array<i64: 1, 128>}, {pipeline_mode = #tpu.pipeline_mode<synchronous>, transform_indices = @transform_4, window_bounds = array<i64: 1, 128>}, {pipeline_mode = #tpu.pipeline_mode<synchronous>, transform_indices = @transform_5, window_bounds = array<i64: 128, 128>}, {pipeline_mode = #tpu.pipeline_mode<synchronous>, transform_indices = @transform_6, window_bounds = array<i64: 1, 128>}, {pipeline_mode = #tpu.pipeline_mode<synchronous>, transform_indices = @transform_7, window_bounds = array<i64: 1, 128>}, {pipeline_mode = #tpu.pipeline_mode<synchronous>, transform_indices = @transform_8, window_bounds = array<i64: 1, 128>}, {pipeline_mode = #tpu.pipeline_mode<synchronous>, transform_indices = @transform_9, window_bounds = array<i64: 128, 128>}, {pipeline_mode = #tpu.pipeline_mode<synchronous>, transform_indices = @transform_10, window_bounds = array<i64: 1, 128>}, {transform_indices = @transform_11, window_bounds = array<i64: 128, 128>}]} {
    %c128_i32 = arith.constant 128 : i32
    %0 = arith.muli %arg1, %c128_i32 : i32
    %1 = tpu.iota {dimensions = array<i32: 0>} : vector<128x1xi32>
    %2 = vector.broadcast %0 : i32 to vector<128x1xi32>
    %3 = arith.addi %2, %1 : vector<128x1xi32>
    %c200_i32 = arith.constant 200 : i32
    %4 = vector.broadcast %c200_i32 : i32 to vector<128x1xi32>
    %5 = arith.cmpi slt, %3, %4 : vector<128x1xi32>
    %c0_i32 = arith.constant 0 : i32
    %6 = arith.cmpi eq, %arg0, %c0_i32 : i32
    %7 = arith.extui %6 : i1 to i32
    %c0_i32_0 = arith.constant 0 : i32
    %8 = arith.cmpi ne, %7, %c0_i32_0 : i32
    scf.if %8 {
      %c0_i32_4 = arith.constant 0 : i32
      %15 = arith.cmpi eq, %arg1, %c0_i32_4 : i32
      %16 = arith.extui %15 : i1 to i32
      %c0_i32_5 = arith.constant 0 : i32
      %17 = arith.cmpi ne, %16, %c0_i32_5 : i32
      scf.if %17 {
        %cst_24 = arith.constant 0.000000e+00 : f32
        %41 = vector.broadcast %cst_24 : f32 to vector<1x128xf32>
        %c0_25 = arith.constant 0 : index
        %c0_26 = arith.constant 0 : index
        %42 = vector.load %arg14[%c0_25, %c0_26] : memref<1x128xf32, #tpu.memory_space<vmem>>, vector<1x128xf32>
        tpu.vector_store %arg14[%c0_25, %c0_26], %41 {strides = array<i32>} : memref<1x128xf32, #tpu.memory_space<vmem>>, vector<1x128xf32>,
        %cst_27 = arith.constant 0.000000e+00 : f32
        %43 = vector.broadcast %cst_27 : f32 to vector<1x128xf32>
        %c0_28 = arith.constant 0 : index
        %c0_29 = arith.constant 0 : index
        %44 = vector.load %arg15[%c0_28, %c0_29] : memref<1x128xf32, #tpu.memory_space<vmem>>, vector<1x128xf32>
        tpu.vector_store %arg15[%c0_28, %c0_29], %43 {strides = array<i32>} : memref<1x128xf32, #tpu.memory_space<vmem>>, vector<1x128xf32>,
      } else {
      }
      %c0 = arith.constant 0 : index
      %c0_6 = arith.constant 0 : index
      %18 = vector.load %arg2[%c0, %c0_6] : memref<128x32xf32, #tpu.memory_space<vmem>>, vector<128x32xf32>
      %c0_7 = arith.constant 0 : index
      %c0_8 = arith.constant 0 : index
      %19 = vector.load %arg3[%c0_7, %c0_8] : memref<32x128xf32, #tpu.memory_space<vmem>>, vector<32x128xf32>
      %cst_9 = arith.constant dense<0.000000e+00> : vector<128x128xf32>
      %20 = tpu.matmul %18, %19, %cst_9 {dimension_numbers = #tpu.dot_dimension_numbers<[1], [0], [0], [1], [0, 0, 1, 1], [], []>} : vector<128x32xf32>, vector<32x128xf32>, vector<128x128xf32> -> vector<128x128xf32>
      %c0_10 = arith.constant 0 : index
      %c0_11 = arith.constant 0 : index
      %21 = vector.load %arg4[%c0_10, %c0_11] : memref<1x128xf32, #tpu.memory_space<vmem>>, vector<1x128xf32>
      %22 = vector.broadcast %21 : vector<1x128xf32> to vector<128x128xf32>
      %23 = arith.addf %20, %22 : vector<128x128xf32>
      %cst_12 = arith.constant 0.000000e+00 : f32
      %24 = vector.broadcast %cst_12 : f32 to vector<128x128xf32>
      %25 = arith.maximumf %23, %24 : vector<128x128xf32>
      %cst_13 = arith.constant 0.000000e+00 : f32
      %26 = vector.shape_cast %5 : vector<128x1xi1> to vector<128x1xi1>
      %27 = vector.broadcast %26 : vector<128x1xi1> to vector<128x128xi1>
      %28 = vector.broadcast %cst_13 : f32 to vector<128x128xf32>
      %29 = arith.select %27, %25, %28 : vector<128x128xi1>, vector<128x128xf32>
      %c0_14 = arith.constant 0 : index
      %c0_15 = arith.constant 0 : index
      %30 = vector.load %arg14[%c0_14, %c0_15] : memref<1x128xf32, #tpu.memory_space<vmem>>, vector<1x128xf32>
      %cst_16 = arith.constant dense<0.000000e+00> : vector<128xf32>
      %31 = vector.multi_reduction <add>, %29, %cst_16 [0] : vector<128x128xf32> to vector<128xf32>
      %32 = vector.shape_cast %31 : vector<128xf32> to vector<1x128xf32>
      %33 = arith.addf %30, %32 : vector<1x128xf32>
      %c0_17 = arith.constant 0 : index
      %c0_18 = arith.constant 0 : index
      %34 = vector.load %arg14[%c0_17, %c0_18] : memref<1x128xf32, #tpu.memory_space<vmem>>, vector<1x128xf32>
      tpu.vector_store %arg14[%c0_17, %c0_18], %33 {strides = array<i32>} : memref<1x128xf32, #tpu.memory_space<vmem>>, vector<1x128xf32>,
      %c0_19 = arith.constant 0 : index
      %c0_20 = arith.constant 0 : index
      %35 = vector.load %arg15[%c0_19, %c0_20] : memref<1x128xf32, #tpu.memory_space<vmem>>, vector<1x128xf32>
      %36 = arith.mulf %29, %29 : vector<128x128xf32>
      %cst_21 = arith.constant dense<0.000000e+00> : vector<128xf32>
      %37 = vector.multi_reduction <add>, %36, %cst_21 [0] : vector<128x128xf32> to vector<128xf32>
      %38 = vector.shape_cast %37 : vector<128xf32> to vector<1x128xf32>
      %39 = arith.addf %35, %38 : vector<1x128xf32>
      %c0_22 = arith.constant 0 : index
      %c0_23 = arith.constant 0 : index
      %40 = vector.load %arg15[%c0_22, %c0_23] : memref<1x128xf32, #tpu.memory_space<vmem>>, vector<1x128xf32>
      tpu.vector_store %arg15[%c0_22, %c0_23], %39 {strides = array<i32>} : memref<1x128xf32, #tpu.memory_space<vmem>>, vector<1x128xf32>,
    } else {
    }
    %c1_i32 = arith.constant 1 : i32
    %9 = arith.cmpi eq, %arg0, %c1_i32 : i32
    %10 = arith.extui %9 : i1 to i32
    %cst = arith.constant 5.000000e-03 : f32
    %c0_i32_1 = arith.constant 0 : i32
    %11 = arith.cmpi ne, %10, %c0_i32_1 : i32
    scf.if %11 {
      %c0_i32_4 = arith.constant 0 : i32
      %15 = arith.cmpi eq, %arg1, %c0_i32_4 : i32
      %16 = arith.extui %15 : i1 to i32
      %c0_i32_5 = arith.constant 0 : i32
      %17 = arith.cmpi ne, %16, %c0_i32_5 : i32
      scf.if %17 {
        %cst_40 = arith.constant 0.000000e+00 : f32
        %70 = vector.broadcast %cst_40 : f32 to vector<1x128xf32>
        %c0_41 = arith.constant 0 : index
        %c0_42 = arith.constant 0 : index
        %71 = vector.load %arg16[%c0_41, %c0_42] : memref<1x128xf32, #tpu.memory_space<vmem>>, vector<1x128xf32>
        tpu.vector_store %arg16[%c0_41, %c0_42], %70 {strides = array<i32>} : memref<1x128xf32, #tpu.memory_space<vmem>>, vector<1x128xf32>,
        %cst_43 = arith.constant 0.000000e+00 : f32
        %72 = vector.broadcast %cst_43 : f32 to vector<1x128xf32>
        %c0_44 = arith.constant 0 : index
        %c0_45 = arith.constant 0 : index
        %73 = vector.load %arg17[%c0_44, %c0_45] : memref<1x128xf32, #tpu.memory_space<vmem>>, vector<1x128xf32>
        tpu.vector_store %arg17[%c0_44, %c0_45], %72 {strides = array<i32>} : memref<1x128xf32, #tpu.memory_space<vmem>>, vector<1x128xf32>,
      } else {
      }
      %c0 = arith.constant 0 : index
      %c0_6 = arith.constant 0 : index
      %18 = vector.load %arg14[%c0, %c0_6] : memref<1x128xf32, #tpu.memory_space<vmem>>, vector<1x128xf32>
      %19 = vector.broadcast %cst : f32 to vector<1x128xf32>
      %20 = arith.mulf %18, %19 : vector<1x128xf32>
      %c0_7 = arith.constant 0 : index
      %c0_8 = arith.constant 0 : index
      %21 = vector.load %arg15[%c0_7, %c0_8] : memref<1x128xf32, #tpu.memory_space<vmem>>, vector<1x128xf32>
      %22 = vector.broadcast %cst : f32 to vector<1x128xf32>
      %23 = arith.mulf %21, %22 : vector<1x128xf32>
      %24 = arith.mulf %20, %20 : vector<1x128xf32>
      %25 = arith.subf %23, %24 : vector<1x128xf32>
      %cst_9 = arith.constant 0.000000e+00 : f32
      %26 = vector.broadcast %cst_9 : f32 to vector<1x128xf32>
      %27 = arith.maximumf %25, %26 : vector<1x128xf32>
      %c0_10 = arith.constant 0 : index
      %c0_11 = arith.constant 0 : index
      %28 = vector.load %arg5[%c0_10, %c0_11] : memref<1x128xf32, #tpu.memory_space<vmem>>, vector<1x128xf32>
      %cst_12 = arith.constant 9.99999974E-6 : f32
      %29 = vector.broadcast %cst_12 : f32 to vector<1x128xf32>
      %30 = arith.addf %27, %29 : vector<1x128xf32>
      %31 = math.rsqrt %30 : vector<1x128xf32>
      %32 = arith.mulf %28, %31 : vector<1x128xf32>
      %c0_13 = arith.constant 0 : index
      %c0_14 = arith.constant 0 : index
      %33 = vector.load %arg6[%c0_13, %c0_14] : memref<1x128xf32, #tpu.memory_space<vmem>>, vector<1x128xf32>
      %34 = arith.mulf %20, %32 : vector<1x128xf32>
      %35 = arith.subf %33, %34 : vector<1x128xf32>
      %c0_15 = arith.constant 0 : index
      %c0_16 = arith.constant 0 : index
      %36 = vector.load %arg2[%c0_15, %c0_16] : memref<128x32xf32, #tpu.memory_space<vmem>>, vector<128x32xf32>
      %c0_17 = arith.constant 0 : index
      %c0_18 = arith.constant 0 : index
      %37 = vector.load %arg3[%c0_17, %c0_18] : memref<32x128xf32, #tpu.memory_space<vmem>>, vector<32x128xf32>
      %cst_19 = arith.constant dense<0.000000e+00> : vector<128x128xf32>
      %38 = tpu.matmul %36, %37, %cst_19 {dimension_numbers = #tpu.dot_dimension_numbers<[1], [0], [0], [1], [0, 0, 1, 1], [], []>} : vector<128x32xf32>, vector<32x128xf32>, vector<128x128xf32> -> vector<128x128xf32>
      %c0_20 = arith.constant 0 : index
      %c0_21 = arith.constant 0 : index
      %39 = vector.load %arg4[%c0_20, %c0_21] : memref<1x128xf32, #tpu.memory_space<vmem>>, vector<1x128xf32>
      %40 = vector.broadcast %39 : vector<1x128xf32> to vector<128x128xf32>
      %41 = arith.addf %38, %40 : vector<128x128xf32>
      %cst_22 = arith.constant 0.000000e+00 : f32
      %42 = vector.broadcast %cst_22 : f32 to vector<128x128xf32>
      %43 = arith.maximumf %41, %42 : vector<128x128xf32>
      %44 = vector.broadcast %32 : vector<1x128xf32> to vector<128x128xf32>
      %45 = arith.mulf %43, %44 : vector<128x128xf32>
      %46 = vector.broadcast %35 : vector<1x128xf32> to vector<128x128xf32>
      %47 = arith.addf %45, %46 : vector<128x128xf32>
      %c0_23 = arith.constant 0 : index
      %c0_24 = arith.constant 0 : index
      %48 = vector.load %arg7[%c0_23, %c0_24] : memref<128x128xf32, #tpu.memory_space<vmem>>, vector<128x128xf32>
      %cst_25 = arith.constant dense<0.000000e+00> : vector<128x128xf32>
      %49 = tpu.matmul %47, %48, %cst_25 {dimension_numbers = #tpu.dot_dimension_numbers<[1], [0], [0], [1], [0, 0, 1, 1], [], []>} : vector<128x128xf32>, vector<128x128xf32>, vector<128x128xf32> -> vector<128x128xf32>
      %c0_26 = arith.constant 0 : index
      %c0_27 = arith.constant 0 : index
      %50 = vector.load %arg8[%c0_26, %c0_27] : memref<1x128xf32, #tpu.memory_space<vmem>>, vector<1x128xf32>
      %51 = vector.broadcast %50 : vector<1x128xf32> to vector<128x128xf32>
      %52 = arith.addf %49, %51 : vector<128x128xf32>
      %cst_28 = arith.constant 0.000000e+00 : f32
      %53 = vector.broadcast %cst_28 : f32 to vector<128x128xf32>
      %54 = arith.maximumf %52, %53 : vector<128x128xf32>
      %cst_29 = arith.constant 0.000000e+00 : f32
      %55 = vector.shape_cast %5 : vector<128x1xi1> to vector<128x1xi1>
      %56 = vector.broadcast %55 : vector<128x1xi1> to vector<128x128xi1>
      %57 = vector.broadcast %cst_29 : f32 to vector<128x128xf32>
      %58 = arith.select %56, %54, %57 : vector<128x128xi1>, vector<128x128xf32>
      %c0_30 = arith.constant 0 : index
      %c0_31 = arith.constant 0 : index
      %59 = vector.load %arg16[%c0_30, %c0_31] : memref<1x128xf32, #tpu.memory_space<vmem>>, vector<1x128xf32>
      %cst_32 = arith.constant dense<0.000000e+00> : vector<128xf32>
      %60 = vector.multi_reduction <add>, %58, %cst_32 [0] : vector<128x128xf32> to vector<128xf32>
      %61 = vector.shape_cast %60 : vector<128xf32> to vector<1x128xf32>
      %62 = arith.addf %59, %61 : vector<1x128xf32>
      %c0_33 = arith.constant 0 : index
      %c0_34 = arith.constant 0 : index
      %63 = vector.load %arg16[%c0_33, %c0_34] : memref<1x128xf32, #tpu.memory_space<vmem>>, vector<1x128xf32>
      tpu.vector_store %arg16[%c0_33, %c0_34], %62 {strides = array<i32>} : memref<1x128xf32, #tpu.memory_space<vmem>>, vector<1x128xf32>,
      %c0_35 = arith.constant 0 : index
      %c0_36 = arith.constant 0 : index
      %64 = vector.load %arg17[%c0_35, %c0_36] : memref<1x128xf32, #tpu.memory_space<vmem>>, vector<1x128xf32>
      %65 = arith.mulf %58, %58 : vector<128x128xf32>
      %cst_37 = arith.constant dense<0.000000e+00> : vector<128xf32>
      %66 = vector.multi_reduction <add>, %65, %cst_37 [0] : vector<128x128xf32> to vector<128xf32>
      %67 = vector.shape_cast %66 : vector<128xf32> to vector<1x128xf32>
      %68 = arith.addf %64, %67 : vector<1x128xf32>
      %c0_38 = arith.constant 0 : index
      %c0_39 = arith.constant 0 : index
      %69 = vector.load %arg17[%c0_38, %c0_39] : memref<1x128xf32, #tpu.memory_space<vmem>>, vector<1x128xf32>
      tpu.vector_store %arg17[%c0_38, %c0_39], %68 {strides = array<i32>} : memref<1x128xf32, #tpu.memory_space<vmem>>, vector<1x128xf32>,
    } else {
    }
    %c2_i32 = arith.constant 2 : i32
    %12 = arith.cmpi eq, %arg0, %c2_i32 : i32
    %13 = arith.extui %12 : i1 to i32
    %cst_2 = arith.constant 5.000000e-03 : f32
    %c0_i32_3 = arith.constant 0 : i32
    %14 = arith.cmpi ne, %13, %c0_i32_3 : i32
    scf.if %14 {
      %c0 = arith.constant 0 : index
      %c0_4 = arith.constant 0 : index
      %15 = vector.load %arg14[%c0, %c0_4] : memref<1x128xf32, #tpu.memory_space<vmem>>, vector<1x128xf32>
      %16 = vector.broadcast %cst_2 : f32 to vector<1x128xf32>
      %17 = arith.mulf %15, %16 : vector<1x128xf32>
      %c0_5 = arith.constant 0 : index
      %c0_6 = arith.constant 0 : index
      %18 = vector.load %arg15[%c0_5, %c0_6] : memref<1x128xf32, #tpu.memory_space<vmem>>, vector<1x128xf32>
      %19 = vector.broadcast %cst_2 : f32 to vector<1x128xf32>
      %20 = arith.mulf %18, %19 : vector<1x128xf32>
      %21 = arith.mulf %17, %17 : vector<1x128xf32>
      %22 = arith.subf %20, %21 : vector<1x128xf32>
      %cst_7 = arith.constant 0.000000e+00 : f32
      %23 = vector.broadcast %cst_7 : f32 to vector<1x128xf32>
      %24 = arith.maximumf %22, %23 : vector<1x128xf32>
      %c0_8 = arith.constant 0 : index
      %c0_9 = arith.constant 0 : index
      %25 = vector.load %arg5[%c0_8, %c0_9] : memref<1x128xf32, #tpu.memory_space<vmem>>, vector<1x128xf32>
      %cst_10 = arith.constant 9.99999974E-6 : f32
      %26 = vector.broadcast %cst_10 : f32 to vector<1x128xf32>
      %27 = arith.addf %24, %26 : vector<1x128xf32>
      %28 = math.rsqrt %27 : vector<1x128xf32>
      %29 = arith.mulf %25, %28 : vector<1x128xf32>
      %c0_11 = arith.constant 0 : index
      %c0_12 = arith.constant 0 : index
      %30 = vector.load %arg6[%c0_11, %c0_12] : memref<1x128xf32, #tpu.memory_space<vmem>>, vector<1x128xf32>
      %31 = arith.mulf %17, %29 : vector<1x128xf32>
      %32 = arith.subf %30, %31 : vector<1x128xf32>
      %c0_13 = arith.constant 0 : index
      %c0_14 = arith.constant 0 : index
      %33 = vector.load %arg2[%c0_13, %c0_14] : memref<128x32xf32, #tpu.memory_space<vmem>>, vector<128x32xf32>
      %c0_15 = arith.constant 0 : index
      %c0_16 = arith.constant 0 : index
      %34 = vector.load %arg3[%c0_15, %c0_16] : memref<32x128xf32, #tpu.memory_space<vmem>>, vector<32x128xf32>
      %cst_17 = arith.constant dense<0.000000e+00> : vector<128x128xf32>
      %35 = tpu.matmul %33, %34, %cst_17 {dimension_numbers = #tpu.dot_dimension_numbers<[1], [0], [0], [1], [0, 0, 1, 1], [], []>} : vector<128x32xf32>, vector<32x128xf32>, vector<128x128xf32> -> vector<128x128xf32>
      %c0_18 = arith.constant 0 : index
      %c0_19 = arith.constant 0 : index
      %36 = vector.load %arg4[%c0_18, %c0_19] : memref<1x128xf32, #tpu.memory_space<vmem>>, vector<1x128xf32>
      %37 = vector.broadcast %36 : vector<1x128xf32> to vector<128x128xf32>
      %38 = arith.addf %35, %37 : vector<128x128xf32>
      %cst_20 = arith.constant 0.000000e+00 : f32
      %39 = vector.broadcast %cst_20 : f32 to vector<128x128xf32>
      %40 = arith.maximumf %38, %39 : vector<128x128xf32>
      %41 = vector.broadcast %29 : vector<1x128xf32> to vector<128x128xf32>
      %42 = arith.mulf %40, %41 : vector<128x128xf32>
      %43 = vector.broadcast %32 : vector<1x128xf32> to vector<128x128xf32>
      %44 = arith.addf %42, %43 : vector<128x128xf32>
      %c0_21 = arith.constant 0 : index
      %c0_22 = arith.constant 0 : index
      %45 = vector.load %arg16[%c0_21, %c0_22] : memref<1x128xf32, #tpu.memory_space<vmem>>, vector<1x128xf32>
      %46 = vector.broadcast %cst_2 : f32 to vector<1x128xf32>
      %47 = arith.mulf %45, %46 : vector<1x128xf32>
      %c0_23 = arith.constant 0 : index
      %c0_24 = arith.constant 0 : index
      %48 = vector.load %arg17[%c0_23, %c0_24] : memref<1x128xf32, #tpu.memory_space<vmem>>, vector<1x128xf32>
      %49 = vector.broadcast %cst_2 : f32 to vector<1x128xf32>
      %50 = arith.mulf %48, %49 : vector<1x128xf32>
      %51 = arith.mulf %47, %47 : vector<1x128xf32>
      %52 = arith.subf %50, %51 : vector<1x128xf32>
      %cst_25 = arith.constant 0.000000e+00 : f32
      %53 = vector.broadcast %cst_25 : f32 to vector<1x128xf32>
      %54 = arith.maximumf %52, %53 : vector<1x128xf32>
      %c0_26 = arith.constant 0 : index
      %c0_27 = arith.constant 0 : index
      %55 = vector.load %arg9[%c0_26, %c0_27] : memref<1x128xf32, #tpu.memory_space<vmem>>, vector<1x128xf32>
      %cst_28 = arith.constant 9.99999974E-6 : f32
      %56 = vector.broadcast %cst_28 : f32 to vector<1x128xf32>
      %57 = arith.addf %54, %56 : vector<1x128xf32>
      %58 = math.rsqrt %57 : vector<1x128xf32>
      %59 = arith.mulf %55, %58 : vector<1x128xf32>
      %c0_29 = arith.constant 0 : index
      %c0_30 = arith.constant 0 : index
      %60 = vector.load %arg10[%c0_29, %c0_30] : memref<1x128xf32, #tpu.memory_space<vmem>>, vector<1x128xf32>
      %61 = arith.mulf %47, %59 : vector<1x128xf32>
      %62 = arith.subf %60, %61 : vector<1x128xf32>
      %c0_31 = arith.constant 0 : index
      %c0_32 = arith.constant 0 : index
      %63 = vector.load %arg7[%c0_31, %c0_32] : memref<128x128xf32, #tpu.memory_space<vmem>>, vector<128x128xf32>
      %cst_33 = arith.constant dense<0.000000e+00> : vector<128x128xf32>
      %64 = tpu.matmul %44, %63, %cst_33 {dimension_numbers = #tpu.dot_dimension_numbers<[1], [0], [0], [1], [0, 0, 1, 1], [], []>} : vector<128x128xf32>, vector<128x128xf32>, vector<128x128xf32> -> vector<128x128xf32>
      %c0_34 = arith.constant 0 : index
      %c0_35 = arith.constant 0 : index
      %65 = vector.load %arg8[%c0_34, %c0_35] : memref<1x128xf32, #tpu.memory_space<vmem>>, vector<1x128xf32>
      %66 = vector.broadcast %65 : vector<1x128xf32> to vector<128x128xf32>
      %67 = arith.addf %64, %66 : vector<128x128xf32>
      %cst_36 = arith.constant 0.000000e+00 : f32
      %68 = vector.broadcast %cst_36 : f32 to vector<128x128xf32>
      %69 = arith.maximumf %67, %68 : vector<128x128xf32>
      %70 = vector.broadcast %59 : vector<1x128xf32> to vector<128x128xf32>
      %71 = arith.mulf %69, %70 : vector<128x128xf32>
      %72 = vector.broadcast %62 : vector<1x128xf32> to vector<128x128xf32>
      %73 = arith.addf %71, %72 : vector<128x128xf32>
      %c0_37 = arith.constant 0 : index
      %c0_38 = arith.constant 0 : index
      %74 = vector.load %arg11[%c0_37, %c0_38] : memref<128x128xf32, #tpu.memory_space<vmem>>, vector<128x128xf32>
      %cst_39 = arith.constant dense<0.000000e+00> : vector<128x128xf32>
      %75 = tpu.matmul %73, %74, %cst_39 {dimension_numbers = #tpu.dot_dimension_numbers<[1], [0], [0], [1], [0, 0, 1, 1], [], []>} : vector<128x128xf32>, vector<128x128xf32>, vector<128x128xf32> -> vector<128x128xf32>
      %c0_40 = arith.constant 0 : index
      %c0_41 = arith.constant 0 : index
      %76 = vector.load %arg12[%c0_40, %c0_41] : memref<1x128xf32, #tpu.memory_space<vmem>>, vector<1x128xf32>
      %77 = vector.broadcast %76 : vector<1x128xf32> to vector<128x128xf32>
      %78 = arith.addf %75, %77 : vector<128x128xf32>
      %79 = arith.mulf %78, %78 : vector<128x128xf32>
      %cst_42 = arith.constant dense<0.000000e+00> : vector<128xf32>
      %80 = vector.multi_reduction <add>, %79, %cst_42 [1] : vector<128x128xf32> to vector<128xf32>
      %81 = vector.shape_cast %80 : vector<128xf32> to vector<128x1xf32>
      %cst_43 = arith.constant 1.000000e-24 : f32
      %82 = vector.broadcast %cst_43 : f32 to vector<128x1xf32>
      %83 = arith.maximumf %81, %82 : vector<128x1xf32>
      %84 = math.rsqrt %83 : vector<128x1xf32>
      %85 = vector.broadcast %84 : vector<128x1xf32> to vector<128x128xf32>
      %86 = arith.mulf %78, %85 : vector<128x128xf32>
      %c0_44 = arith.constant 0 : index
      %c0_45 = arith.constant 0 : index
      %87 = vector.load %arg13[%c0_44, %c0_45] : memref<128x128xf32, #tpu.memory_space<vmem>>, vector<128x128xf32>
      tpu.vector_store %arg13[%c0_44, %c0_45], %86 {strides = array<i32>} : memref<128x128xf32, #tpu.memory_space<vmem>>, vector<128x128xf32>,
    } else {
    }
    return
  }
  func.func @transform_0(%arg0: i32, %arg1: i32) -> (i32, i32) {
    %c0_i32 = arith.constant 0 : i32
    %c0_i32_0 = arith.constant 0 : i32
    return %arg1, %c0_i32 : i32, i32
  }
  func.func @transform_1(%arg0: i32, %arg1: i32) -> (i32, i32) {
    %c0_i32 = arith.constant 0 : i32
    %c0_i32_0 = arith.constant 0 : i32
    %c0_i32_1 = arith.constant 0 : i32
    return %c0_i32, %c0_i32_0 : i32, i32
  }
  func.func @transform_2(%arg0: i32, %arg1: i32) -> (i32, i32) {
    %c0_i32 = arith.constant 0 : i32
    %c0_i32_0 = arith.constant 0 : i32
    %c0_i32_1 = arith.constant 0 : i32
    return %c0_i32, %c0_i32_0 : i32, i32
  }
  func.func @transform_3(%arg0: i32, %arg1: i32) -> (i32, i32) {
    %c0_i32 = arith.constant 0 : i32
    %c0_i32_0 = arith.constant 0 : i32
    %c0_i32_1 = arith.constant 0 : i32
    return %c0_i32, %c0_i32_0 : i32, i32
  }
  func.func @transform_4(%arg0: i32, %arg1: i32) -> (i32, i32) {
    %c0_i32 = arith.constant 0 : i32
    %c0_i32_0 = arith.constant 0 : i32
    %c0_i32_1 = arith.constant 0 : i32
    return %c0_i32, %c0_i32_0 : i32, i32
  }
  func.func @transform_5(%arg0: i32, %arg1: i32) -> (i32, i32) {
    %c0_i32 = arith.constant 0 : i32
    %c0_i32_0 = arith.constant 0 : i32
    %c0_i32_1 = arith.constant 0 : i32
    return %c0_i32, %c0_i32_0 : i32, i32
  }
  func.func @transform_6(%arg0: i32, %arg1: i32) -> (i32, i32) {
    %c0_i32 = arith.constant 0 : i32
    %c0_i32_0 = arith.constant 0 : i32
    %c0_i32_1 = arith.constant 0 : i32
    return %c0_i32, %c0_i32_0 : i32, i32
  }
  func.func @transform_7(%arg0: i32, %arg1: i32) -> (i32, i32) {
    %c0_i32 = arith.constant 0 : i32
    %c0_i32_0 = arith.constant 0 : i32
    %c0_i32_1 = arith.constant 0 : i32
    return %c0_i32, %c0_i32_0 : i32, i32
  }
  func.func @transform_8(%arg0: i32, %arg1: i32) -> (i32, i32) {
    %c0_i32 = arith.constant 0 : i32
    %c0_i32_0 = arith.constant 0 : i32
    %c0_i32_1 = arith.constant 0 : i32
    return %c0_i32, %c0_i32_0 : i32, i32
  }
  func.func @transform_9(%arg0: i32, %arg1: i32) -> (i32, i32) {
    %c0_i32 = arith.constant 0 : i32
    %c0_i32_0 = arith.constant 0 : i32
    %c0_i32_1 = arith.constant 0 : i32
    return %c0_i32, %c0_i32_0 : i32, i32
  }
  func.func @transform_10(%arg0: i32, %arg1: i32) -> (i32, i32) {
    %c0_i32 = arith.constant 0 : i32
    %c0_i32_0 = arith.constant 0 : i32
    %c0_i32_1 = arith.constant 0 : i32
    return %c0_i32, %c0_i32_0 : i32, i32
  }
  func.func @transform_11(%arg0: i32, %arg1: i32) -> (i32, i32) {
    %c0_i32 = arith.constant 0 : i32
    %c0_i32_0 = arith.constant 0 : i32
    return %arg1, %c0_i32 : i32, i32
  }
}

</mosaic_0001>

<bundles_post_ra>
// kernel: tpu_custom_call.1
= control target key start
LH: loop header
LB: loop body
LE: loop exit
PB: predicated region body
PF: predicated region fallthrough
CT: control target
= control target key end

     0   :  { %s4175_s0 = inlined_call_operand.vmem [shape: f32[256,32], index: 0, kind: input, shape index: {}]   ;;  %s4176_s1 = inlined_call_operand.vmem [shape: f32[32,128], index: 1, kind: input, shape index: {}]   ;;  %s4177_s2 = inlined_call_operand.vmem [shape: f32[1,128], index: 2, kind: input, shape index: {}]   ;;  %s4178_s3 = inlined_call_operand.vmem [shape: f32[1,128], index: 3, kind: input, shape index: {}]   ;;  %s4179_s4 = inlined_call_operand.vmem [shape: f32[1,128], index: 4, kind: input, shape index: {}]   ;;  %s4180_s5 = inlined_call_operand.vmem [shape: f32[128,128], index: 5, kind: input, shape index: {}]   ;;  %s4181_s6 = inlined_call_operand.vmem [shape: f32[1,128], index: 6, kind: input, shape index: {}]   ;;  %s4182_s7 = inlined_call_operand.vmem [shape: f32[1,128], index: 7, kind: input, shape index: {}]   ;;  %s4183_s8 = inlined_call_operand.vmem [shape: f32[1,128], index: 8, kind: input, shape index: {}]   ;;  %s4184_s9 = inlined_call_operand.vmem [shape: f32[128,128], index: 9, kind: input, shape index: {}]   ;;  %s4185_s10 = inlined_call_operand.vmem [shape: f32[1,128], index: 10, kind: input, shape index: {}]   ;;  %s4186_s11 = inlined_call_operand.hbm [shape: f32[256,128], index: 11, kind: output, shape index: {}]  }
   0x1   :  { %4190 = sst [smem:[#allocation12_spill]] %s4175_s0 }
   0x2   :  { %16 = vsyncpa [#allocation7], 0 }
   0x3   :  { %18 = vsyncpa [#allocation7 + $0x1], 0  ;;  %s3243_s17 = smov 0   ;;  %s3245_s18 = smov 0  }
   0x4   :  { %s3247_s19 = smov 0   ;;  %s3249_s20 = smov 0  }
   0x5   :  { %s3251_s21 = smov 0   ;;  %s3253_s22 = smov 0  }
   0x6   :  { %s3255_s23 = smov 0   ;;  %s3257_s24 = smov 0  }
   0x7 LB: > { %4191 = sst [smem:[#allocation9_spill]] %s3172_s23  ;;  %s2319_s25 = sadd.s32 4294967295, %s3176_s24   ;;  %s3176_s24 = sphi %s3257_s24, %s24_s24   ;;  %s3172_s23 = sphi %s3255_s23, %s4202_s23   ;;  %s3168_s22 = sphi %s3253_s22, %s4207_s22   ;;  %s3164_s21 = sphi %s3251_s21, %s4200_s21   ;;  %s3160_s20 = sphi %s3249_s20, %s4206_s20   ;;  %s3156_s19 = sphi %s3247_s19, %s4205_s19   ;;  %s3152_s18 = sphi %s3245_s18, %s4204_s18   ;;  %s3148_s17 = sphi %s3243_s17, %s4203_s17  }
   0x8   : > { %s2320_s26 = sadd.s32 4294967294, %s3176_s24   ;;  %s33_s27 = sadd.s32 1, %s3168_s22 }
   0x9   : > { %s36_s28 = sadd.s32 1, %s3172_s23  ;;  %p34_p0 = scmp.ge.s32.totalorder %s33_s27, 2 }
   0xa   : > { %s279_s29 = sadd.s32 1, %s3156_s19  ;;  %p289_p1 = scmp.ne.s32.totalorder %s3156_s19, %s3152_s18 }
   0xb   : > { %p290_p2 = scmp.eq.s32.totalorder %s2319_s25, 5  ;;  %s4209_s27 = smov (%p34_p0, %s33_s27), 0 }
   0xc   : > { %4192 = sst [smem:[#allocation10_spill]] %s4209_s27  ;;  %s4211_s28 = smov (!%p34_p0, %s36_s28), %s3172_s23 }
   0xd   : > { %s276_s30 = ssub.s32 %s3168_s22, %s4209_s27  ;;  %p3295_p3 = por %p290_p2, %p289_p1 }
   0xe   : > { %p38_p4 = scmp.ge.s32.totalorder %s4211_s28, 3  ;;  %p277_p5 = scmp.eq.s32.totalorder %s276_s30, 0 }
   0xf   : > { %p295_p6 = scmp.ne.s32.totalorder %s3152_s18, %s3148_s17  ;;  %p296_p7 = scmp.eq.s32.totalorder %s2320_s26, 5 }
  0x10   : > { %s4213_s28 = smov (%p38_p4, %s4211_s28), 0  ;;  %p2323_p9 = scmp.ge.s32.totalorder %s3176_s24, 1 }
  0x11   : > { %4194 = sst [smem:[#allocation11_spill]] %s4213_s28  ;;  %p3306_p8 = por %p296_p7, %p295_p6 }
  0x12   : > { %s3304_s13 = scalar_select %p277_p5, %s3156_s19, %s279_s29  }
  0x13   : > { %p353_p10 = scmp.lt.s32.totalorder %s3176_s24, 7 }
  0x15   : > { %p354_p11 = pnand %p2323_p9, %p353_p10 }
  0x16   : > { %s4187_s15 = sand.u32 (!%p354_p11), 1, %s3152_s18   ;;  %s2325_s16 = sshll.u32 (!%p354_p11), %s3160_s20, 4  ;;  %v401_v0 = vlaneseq (!%p354_p11) }
  0x17   : > { %357 = sbr.rel (%p354_p11) target bundleno = 1727 (0x6bf), region = 64  ;;  %s3316_s25 = sshll.u32 (!%p354_p11), %s4187_s15, 7 }
  0x18   : > { %p394_p12 = scmp.lt.s32.totalorder (!%p354_p11), %s2325_s16, 31  ;;  %s2327_s26 = sshll.u32 (!%p354_p11), %s3160_s20, 7  ;;  %v3319_v1 = vshrl.u32 (!%p354_p11), %v401_v0, 7 }
  0x19   : > { %v418_v2 = vstv (!%p354_p11), %s2327_s26  ;;  %s4196_s0 = sld [smem:[#allocation12_spill]] (!%p354_p11)  ;;  %s3391_s15 = scalar_lea.vmem (!%p354_p11), [#allocation6], %s3316_s25 }
  0x1a   : > { %v403_v3 = vadd.s32 (!%p354_p11), 8, %v3319_v1  ;;  %v404_v4 = vadd.s32 (!%p354_p11), 16, %v3319_v1  ;;  %v405_v5 = vadd.s32 (!%p354_p11), 24, %v3319_v1  ;;  %v406_v6 = vadd.s32 (!%p354_p11), 32, %v3319_v1  ;;  %p2328_p13 = scmp.ne.s32.totalorder (!%p354_p11), %s3164_s21, 0 }
  0x1b   : > { %v407_v7 = vadd.s32 (!%p354_p11), 40, %v3319_v1  ;;  %v408_v8 = vadd.s32 (!%p354_p11), 48, %v3319_v1  ;;  %v409_v9 = vadd.s32 (!%p354_p11), 56, %v3319_v1  ;;  %v410_v10 = vadd.s32 (!%p354_p11), 64, %v3319_v1 }
  0x1c   : > { %v411_v11 = vadd.s32 (!%p354_p11), 72, %v3319_v1  ;;  %v412_v12 = vadd.s32 (!%p354_p11), 80, %v3319_v1  ;;  %v413_v13 = vadd.s32 (!%p354_p11), 88, %v3319_v1  ;;  %v414_v14 = vadd.s32 (!%p354_p11), 96, %v3319_v1 }
  0x1d   : > { %v415_v15 = vadd.s32 (!%p354_p11), 104, %v3319_v1  ;;  %v416_v16 = vadd.s32 (!%p354_p11), 112, %v3319_v1  ;;  %v417_v17 = vadd.s32 (!%p354_p11), 120, %v3319_v1  ;;  %v3342_v18 = vadd.s32 (!%p354_p11), %v418_v2, %v3319_v1 }
  0x1e   : > { %s4215_s16 = smov (!%p394_p12, %s2325_s16), 31  ;;  %v3344_v19 = vadd.s32 %v418_v2, %v403_v3  ;;  %v3346_v20 = vadd.s32 %v418_v2, %v404_v4  ;;  %v3348_v21 = vadd.s32 %v418_v2, %v405_v5  ;;  %v3350_v22 = vadd.s32 %v418_v2, %v406_v6  ;;  %p2329_p0 = scmp.ne.s32.totalorder (!%p2328_p13), %s3160_s20, 0 }
  0x1f   : > { %s2326_s29 = sshll.u32 %s4215_s16, 3  ;;  %v3352_v23 = vadd.s32 %v418_v2, %v407_v7  ;;  %v3354_v24 = vadd.s32 %v418_v2, %v408_v8  ;;  %v3356_v25 = vadd.s32 %v418_v2, %v409_v9  ;;  %v3358_v26 = vadd.s32 %v418_v2, %v410_v10  ;;  %454 = sbr.rel (%p2328_p13) target bundleno = 323 (0x143), region = 68 }
  0x20   : > { %s3332_s26 = scalar_lea.vmem %s4196_s0, %s2326_s29  ;;  %v3360_v27 = vadd.s32 %v418_v2, %v411_v11  ;;  %v3362_v28 = vadd.s32 %v418_v2, %v412_v12  ;;  %v3364_v29 = vadd.s32 %v418_v2, %v413_v13  ;;  %v3366_v30 = vadd.s32 %v418_v2, %v414_v14 }
  0x21   : > { %v3368_v31 = vadd.s32 %v418_v2, %v415_v15  ;;  %v3370_v32 = vadd.s32 %v418_v2, %v416_v16  ;;  %v3372_v33 = vadd.s32 %v418_v2, %v417_v17  ;;  %vm435_vm0 = vcmp.lt.s32.totalorder %v3342_v18, 200 }
  0x22   : > { %vm436_vm1 = vcmp.lt.s32.totalorder %v3344_v19, 200  ;;  %vm437_vm2 = vcmp.lt.s32.totalorder %v3346_v20, 200  ;;  %vm438_vm3 = vcmp.lt.s32.totalorder %v3348_v21, 200  ;;  %vm439_vm4 = vcmp.lt.s32.totalorder %v3350_v22, 200 }
  0x23   : > { %vm440_vm5 = vcmp.lt.s32.totalorder %v3352_v23, 200  ;;  %vm441_vm6 = vcmp.lt.s32.totalorder %v3354_v24, 200  ;;  %vm442_vm7 = vcmp.lt.s32.totalorder %v3356_v25, 200  ;;  %vm443_vm8 = vcmp.lt.s32.totalorder %v3358_v26, 200 }
  0x24   : > { %vm444_vm9 = vcmp.lt.s32.totalorder %v3360_v27, 200  ;;  %vm445_vm10 = vcmp.lt.s32.totalorder %v3362_v28, 200  ;;  %vm446_vm11 = vcmp.lt.s32.totalorder %v3364_v29, 200  ;;  %vm447_vm12 = vcmp.lt.s32.totalorder %v3366_v30, 200 }
  0x25   : > { %vm448_vm13 = vcmp.lt.s32.totalorder %v3368_v31, 200  ;;  %vm449_vm14 = vcmp.lt.s32.totalorder %v3370_v32, 200 }
  0x26   : > { %458 = sbr.rel (%p2329_p0) target bundleno = 45 (0x2d), region = 72  ;;  %v3178_v34 = vmov (!%p2329_p0), 0.0  }
  0x27   : > { %459 = vst [vmem:[#allocation2] sm:$0x1] (!%p2329_p0), %v3178_v34  ;;  %460 = vst [vmem:[#allocation3] sm:$0x1] (!%p2329_p0), %v3178_v34 }
  0x2d PF: > { %v477_v35 = vld [vmem:[%s4176_s1] sm:$0xff]  ;;  %v478_v36 = vld [vmem:[%s4176_s1 + $0x8] sm:$0xff]  ;;  %v479_v37 = vld [vmem:[%s4176_s1 + $0x10] sm:$0xff]  ;;  %vm488_vm15 = vcmask 261120  }
  0x2e   : > { %v2813_v38 = vpack.c.bf16 %v478_v36, %v477_v35  ;;  %v480_v39 = vld [vmem:[%s4176_s1 + $0x18] sm:$0xff]  ;;  %v461_v40 = vld [vmem:[%s3332_s26] sm:$0xff]  ;;  %v462_v43 = vld [vmem:[%s3332_s26 + $0x8] sm:$0xff] }
  0x2f   : > { %v2817_v41 = vpack.c.bf16 %v480_v39, %v479_v37  ;;  %2557 = vmatprep.mubr.msk.f32.mxu0 %vm488_vm15, %v461_v40  ;;  %v469_v42 = vld [vmem:[%s3332_s26 + $0x40] sm:$0xff]  ;;  %v470_v44 = vld [vmem:[%s3332_s26 + $0x48] sm:$0xff]  ;;  %v463_v45 = vld [vmem:[%s3332_s26 + $0x10] sm:$0xff] }
  0x30   : > { %2814 = vmatprep.subr.bf16.mxu0 %v2813_v38  ;;  %2933 = vmatprep.subr.bf16.mxu1 %v2813_v38  ;;  %v471_v46 = vld [vmem:[%s3332_s26 + $0x50] sm:$0xff]  ;;  %v464_v47 = vld [vmem:[%s3332_s26 + $0x18] sm:$0xff]  ;;  %v465_v49 = vld [vmem:[%s3332_s26 + $0x20] sm:$0xff] }
  0x31   : > { %2816 = vmatpush3.bf16.msra.mxu0 %v2813_v38  ;;  %2935 = vmatpush3.bf16.msra.mxu1 %v2813_v38  ;;  %v472_v48 = vld [vmem:[%s3332_s26 + $0x58] sm:$0xff]  ;;  %v473_v50 = vld [vmem:[%s3332_s26 + $0x60] sm:$0xff]  ;;  %v466_v51 = vld [vmem:[%s3332_s26 + $0x28] sm:$0xff] }
  0x32   : > { %2818 = vmatprep.subr.bf16.mxu0 %v2817_v41  ;;  %2934 = vmatprep.subr.bf16.mxu1 %v2817_v41  ;;  %v474_v52 = vld [vmem:[%s3332_s26 + $0x68] sm:$0xff]  ;;  %v467_v53 = vld [vmem:[%s3332_s26 + $0x30] sm:$0xff]  ;;  %v468_v55 = vld [vmem:[%s3332_s26 + $0x38] sm:$0xff] }
  0x33   : > { %2569 = vmatprep.mubr.msk.f32.mxu1 %vm488_vm15, %v469_v42  ;;  %v475_v54 = vld [vmem:[%s3332_s26 + $0x70] sm:$0xff]  ;;  %v476_v56 = vld [vmem:[%s3332_s26 + $0x78] sm:$0xff]  ;;  %v3442_v57 = vld [vmem:[%s4177_s2] ss:$0 sm:$0xff] }
  0x35   : > { %2820 = vmatpush3.bf16.msra.mxu0 %v2817_v41  ;;  %2936 = vmatpush3.bf16.msra.mxu1 %v2817_v41 }
  0x38   : > { %2558 = vmatmul.mubr.msk.f32.vlgmr.msra.gmra.mrb[0].mxu0 %vm488_vm15, %v462_v43  ;;  %2570 = vmatmul.mubr.msk.f32.vlgmr.msra.gmra.mrb[0].mxu1 %vm488_vm15, %v470_v44 }
  0x39   : > { %2560 = vmatprep.mubr.msk.f32.mxu0 %vm488_vm15, %v463_v45  ;;  %2572 = vmatprep.mubr.msk.f32.mxu1 %vm488_vm15, %v471_v46 }
  0x3c   : > { %2561 = vmatmul.mubr.msk.f32.gmra.mrb[2].mxu0 %vm488_vm15, %v464_v47  ;;  %2573 = vmatmul.mubr.msk.f32.gmra.mrb[2].mxu1 %vm488_vm15, %v472_v48 }
  0x3d   : > { %2563 = vmatprep.mubr.msk.f32.mxu0 %vm488_vm15, %v465_v49  ;;  %2575 = vmatprep.mubr.msk.f32.mxu1 %vm488_vm15, %v473_v50 }
  0x40   : > { %2564 = vmatmul.mubr.msk.f32.gmra.mrb[4].mxu0 %vm488_vm15, %v466_v51  ;;  %2576 = vmatmul.mubr.msk.f32.gmra.mrb[4].mxu1 %vm488_vm15, %v474_v52 }
  0x41   : > { %2566 = vmatprep.mubr.msk.f32.mxu0 %vm488_vm15, %v467_v53  ;;  %2578 = vmatprep.mubr.msk.f32.mxu1 %vm488_vm15, %v475_v54 }
  0x44   : > { %2567 = vmatmul.mubr.msk.f32.gmra.mrb[6].mxu0 %vm488_vm15, %v468_v55  ;;  %2579 = vmatmul.mubr.msk.f32.gmra.mrb[6].mxu1 %vm488_vm15, %v476_v56  ;;  %vm4197_vm15 = vcmp.lt.s32.totalorder %v3372_v33, 200 }
 0x10b   : > { %v2559_v58 = vpop.f32.mrb[0].mxu0  ;;  %v2571_v59 = vpop.f32.mrb[0].mxu1 }
 0x10c   : > { %v609_v60 = vadd.f32 %v2559_v58, %v3442_v57  ;;  %v603_v61 = vpop.f32.mrb[1].mxu0  ;;  %v643_v62 = vpop.f32.mrb[1].mxu1  ;;  %v649_v47 = vadd.f32 %v2571_v59, %v3442_v57 }
 0x10d   : > { %v604_v63 = vadd.f32 %v3442_v57, %v603_v61  ;;  %v644_v17 = vadd.f32 %v3442_v57, %v643_v62 }
 0x10e   : > { %v683_v0 = vmax.f32 %v609_v60, 0.0 }
 0x10f   : > { %v682_v2 = vmax.f32 %v604_v63, 0.0  ;;  %v2562_v3 = vpop.f32.mrb[2].mxu0  ;;  %v2574_v4 = vpop.f32.mrb[2].mxu1  ;;  %v690_v48 = vmax.f32 %v644_v17, 0.0 }
 0x110   : > { %v731_v5 = vsel %vm436_vm1, %v683_v0, 0.0  ;;  %v619_v6 = vadd.f32 %v2562_v3, %v3442_v57  ;;  %v613_v7 = vpop.f32.mrb[3].mxu0  ;;  %v653_v8 = vpop.f32.mrb[3].mxu1  ;;  %v691_v3 = vmax.f32 %v649_v47, 0.0 }
 0x111   : > { %v772_v9 = vmul.f32 %v731_v5, %v731_v5  ;;  %v730_v10 = vsel %vm435_vm0, %v682_v2, 0.0  ;;  %v614_v11 = vadd.f32 %v3442_v57, %v613_v7  ;;  %v654_v61 = vadd.f32 %v3442_v57, %v653_v8 }
 0x112   : > { %v747_v12 = vadd.f32 %v731_v5, %v730_v10  ;;  %v771_v13 = vmul.f32 %v730_v10, %v730_v10  ;;  %v685_v14 = vmax.f32 %v619_v6, 0.0  ;;  %v659_v5 = vadd.f32 %v2574_v4, %v3442_v57 }
 0x113   : > { %v684_v15 = vmax.f32 %v614_v11, 0.0  ;;  %v2565_v16 = vpop.f32.mrb[4].mxu0  ;;  %v2577_v34 = vpop.f32.mrb[4].mxu1  ;;  %v738_v10 = vsel %vm443_vm8, %v690_v48, 0.0  ;;  %v739_v4 = vsel %vm444_vm9, %v691_v3, 0.0 }
 0x114   : > { %v787_v35 = vadd.f32 %v772_v9, %v771_v13  ;;  %v629_v36 = vadd.f32 %v2565_v16, %v3442_v57  ;;  %v623_v37 = vpop.f32.mrb[5].mxu0  ;;  %v663_v38 = vpop.f32.mrb[5].mxu1  ;;  %v733_v39 = vsel %vm438_vm3, %v685_v14, 0.0  ;;  %v779_v17 = vmul.f32 %v738_v10, %v738_v10 }
 0x115   : > { %v732_v40 = vsel %vm437_vm2, %v684_v15, 0.0  ;;  %v624_v41 = vadd.f32 %v3442_v57, %v623_v37  ;;  %v774_v50 = vmul.f32 %v733_v39, %v733_v39  ;;  %v664_v13 = vadd.f32 %v3442_v57, %v663_v38 }
 0x116   : > { %v748_v42 = vadd.f32 %v747_v12, %v732_v40  ;;  %v773_v43 = vmul.f32 %v732_v40, %v732_v40  ;;  %v687_v44 = vmax.f32 %v629_v36, 0.0  ;;  %v692_v12 = vmax.f32 %v654_v61, 0.0 }
 0x117   : > { %v686_v45 = vmax.f32 %v624_v41, 0.0  ;;  %v2568_v46 = vpop.f32.mrb[6].mxu0  ;;  %v2580_v49 = vpop.f32.mrb[6].mxu1  ;;  %v669_v41 = vadd.f32 %v2577_v34, %v3442_v57 }
 0x118   : > { %v788_v51 = vadd.f32 %v787_v35, %v773_v43  ;;  %v749_v52 = vadd.f32 %v748_v42, %v733_v39  ;;  %v639_v53 = vadd.f32 %v2568_v46, %v3442_v57  ;;  %v633_v54 = vpop.f32.mrb[7].mxu0  ;;  %v673_v55 = vpop.f32.mrb[7].mxu1  ;;  %v735_v56 = vsel %vm440_vm5, %v687_v44, 0.0 }
 0x119   : > { %v734_v58 = vsel %vm439_vm4, %v686_v45, 0.0  ;;  %v634_v60 = vadd.f32 %v3442_v57, %v633_v54  ;;  %v776_v6 = vmul.f32 %v735_v56, %v735_v56  ;;  %v693_v39 = vmax.f32 %v659_v5, 0.0 }
 0x11a   : > { %v750_v59 = vadd.f32 %v749_v52, %v734_v58  ;;  %v775_v62 = vmul.f32 %v734_v58, %v734_v58  ;;  %v789_v63 = vadd.f32 %v788_v51, %v774_v50  ;;  %v689_v0 = vmax.f32 %v639_v53, 0.0 }
 0x11b   : > { %v688_v2 = vmax.f32 %v634_v60, 0.0  ;;  %v740_v40 = vsel %vm445_vm10, %v692_v12, 0.0  ;;  %v694_v42 = vmax.f32 %v664_v13, 0.0  ;;  %v674_v43 = vadd.f32 %v3442_v57, %v673_v55 }
 0x11c   : > { %v790_v7 = vadd.f32 %v789_v63, %v775_v62  ;;  %v751_v9 = vadd.f32 %v750_v59, %v735_v56  ;;  %v737_v11 = vsel %vm442_vm7, %v689_v0, 0.0  ;;  %v780_v45 = vmul.f32 %v739_v4, %v739_v4 }
 0x11d   : > { %v736_v8 = vsel %vm441_vm6, %v688_v2, 0.0  ;;  %v778_v35 = vmul.f32 %v737_v11, %v737_v11  ;;  %v741_v47 = vsel %vm446_vm11, %v693_v39, 0.0  ;;  %v781_v50 = vmul.f32 %v740_v40, %v740_v40  ;;  %v746_v39 = vld [vmem:[#allocation2] sm:$0x1] }
 0x11e   : > { %v752_v14 = vadd.f32 %v751_v9, %v736_v8  ;;  %v777_v15 = vmul.f32 %v736_v8, %v736_v8  ;;  %v791_v16 = vadd.f32 %v790_v7, %v776_v6  ;;  %v695_v51 = vmax.f32 %v669_v41, 0.0 }
 0x11f   : > { %v742_v52 = vsel %vm447_vm12, %v694_v42, 0.0  ;;  %v679_v53 = vadd.f32 %v2580_v49, %v3442_v57  ;;  %v696_v54 = vmax.f32 %v674_v43, 0.0  ;;  %v782_v58 = vmul.f32 %v741_v47, %v741_v47  ;;  %v770_v42 = vld [vmem:[#allocation3] sm:$0x1] }
 0x120   : > { %v792_v36 = vadd.f32 %v791_v16, %v777_v15  ;;  %v753_v37 = vadd.f32 %v752_v14, %v737_v11  ;;  %v783_v61 = vmul.f32 %v742_v52, %v742_v52  ;;  %v743_v59 = vsel %vm448_vm13, %v695_v51, 0.0 }
 0x121   : > { %v697_v62 = vmax.f32 %v679_v53, 0.0  ;;  %v744_v63 = vsel %vm449_vm14, %v696_v54, 0.0  ;;  %v784_v3 = vmul.f32 %v743_v59, %v743_v59 }
 0x122   : > { %v754_v38 = vadd.f32 %v753_v37, %v738_v10  ;;  %v793_v44 = vadd.f32 %v792_v36, %v778_v35  ;;  %v785_v57 = vmul.f32 %v744_v63, %v744_v63 }
 0x123   : > { %v745_v49 = vsel %vm4197_vm15, %v697_v62, 0.0 }
 0x124   : > { %v794_v46 = vadd.f32 %v793_v44, %v779_v17  ;;  %v755_v48 = vadd.f32 %v754_v38, %v739_v4  ;;  %v786_v10 = vmul.f32 %v745_v49, %v745_v49 }
 0x126   : > { %v756_v34 = vadd.f32 %v755_v48, %v740_v40  ;;  %v795_v56 = vadd.f32 %v794_v46, %v780_v45 }
 0x128   : > { %v796_v55 = vadd.f32 %v795_v56, %v781_v50  ;;  %v757_v60 = vadd.f32 %v756_v34, %v741_v47 }
 0x12a   : > { %v758_v0 = vadd.f32 %v757_v60, %v742_v52  ;;  %v797_v2 = vadd.f32 %v796_v55, %v782_v58 }
 0x12c   : > { %v798_v5 = vadd.f32 %v797_v2, %v783_v61  ;;  %v759_v6 = vadd.f32 %v758_v0, %v743_v59 }
 0x12e   : > { %v760_v7 = vadd.f32 %v759_v6, %v744_v63  ;;  %v799_v9 = vadd.f32 %v798_v5, %v784_v3 }
 0x130   : > { %v761_v11 = vadd.f32 %v760_v7, %v745_v49  ;;  %v800_v8 = vadd.f32 %v799_v9, %v785_v57 }
 0x132   : > { %v762_v12 = vrot.slane %v761_v11, 4  ;;  %v801_v13 = vadd.f32 %v800_v8, %v786_v10 }
 0x134   : > { %v763_v14 = vadd.f32 %v762_v12, %v761_v11  ;;  %v802_v15 = vrot.slane %v801_v13, 4 }
 0x136   : > { %v764_v16 = vrot.slane %v763_v14, 2  ;;  %v803_v4 = vadd.f32 %v802_v15, %v801_v13 }
 0x138   : > { %v765_v17 = vadd.f32 %v764_v16, %v763_v14  ;;  %v804_v35 = vrot.slane %v803_v4, 2 }
 0x13a   : > { %v766_v36 = vrot.slane %v765_v17, 1  ;;  %v805_v37 = vadd.f32 %v804_v35, %v803_v4 }
 0x13c   : > { %v767_v40 = vadd.f32 %v766_v36, %v765_v17  ;;  %v806_v41 = vrot.slane %v805_v37, 1 }
 0x13e   : > { %v768_v43 = vadd.f32 %v767_v40, %v746_v39  ;;  %v807_v38 = vadd.f32 %v806_v41, %v805_v37 }
 0x140   : > { %769 = vst [vmem:[#allocation2] sm:$0x1] %v768_v43  ;;  %v808_v44 = vadd.f32 %v807_v38, %v770_v42 }
 0x142   : > { %809 = vst [vmem:[#allocation3] sm:$0x1] %v808_v44 }
 0x143 PF: > { %p2347_p1 = scmp.ne.s32.totalorder %s3164_s21, 1 }
 0x144   : > { %p2348_p2 = scmp.ne.s32.totalorder (!%p2347_p1), %s3160_s20, 0 }
 0x145   : > { %813 = sbr.rel (%p2347_p1) target bundleno = 839 (0x347), region = 76 }
 0x14c   : > { %817 = sbr.rel (%p2348_p2) target bundleno = 339 (0x153), region = 80  ;;  %v3179_v45 = vmov (!%p2348_p2), 0.0  }
 0x14d   : > { %818 = vst [vmem:[#allocation4] sm:$0x1] (!%p2348_p2), %v3179_v45  ;;  %819 = vst [vmem:[#allocation5] sm:$0x1] (!%p2348_p2), %v3179_v45 }
 0x153 PF: > { %v850_v46 = vld [vmem:[%s4176_s1] sm:$0xff]  ;;  %v851_v47 = vld [vmem:[%s4176_s1 + $0x8] sm:$0xff]  ;;  %v852_v48 = vld [vmem:[%s4176_s1 + $0x10] sm:$0xff]  ;;  %vm861_vm15 = vcmask 261120  }
 0x154   : > { %v2821_v50 = vpack.c.bf16 %v851_v47, %v850_v46  ;;  %v853_v51 = vld [vmem:[%s4176_s1 + $0x18] sm:$0xff]  ;;  %v834_v52 = vld [vmem:[%s3332_s26] sm:$0xff]  ;;  %v1116_v34 = vld [vmem:[%s4180_s5 + $0x8] sm:$0xff] }
 0x155   : > { %v2825_v53 = vpack.c.bf16 %v853_v51, %v852_v48  ;;  %2589 = vmatprep.mubr.msk.f32.mxu0 %vm861_vm15, %v834_v52  ;;  %v1115_v54 = vld [vmem:[%s4180_s5] sm:$0xff]  ;;  %v1117_v56 = vld [vmem:[%s4180_s5 + $0x10] sm:$0xff]  ;;  %v1118_v58 = vld [vmem:[%s4180_s5 + $0x18] sm:$0xff] }
 0x156   : > { %2822 = vmatprep.subr.bf16.mxu0 %v2821_v50  ;;  %v835_v55 = vld [vmem:[%s3332_s26 + $0x8] sm:$0xff]  ;;  %v2829_v60 = vpack.c.bf16 %v1116_v34, %v1115_v54  ;;  %v836_v61 = vld [vmem:[%s3332_s26 + $0x10] sm:$0xff]  ;;  %v2833_v59 = vpack.c.bf16 %v1118_v58, %v1117_v56  ;;  %v1119_v62 = vld [vmem:[%s4180_s5 + $0x20] sm:$0xff] }
 0x157   : > { %2824 = vmatpush3.bf16.msra.mxu0 %v2821_v50  ;;  %v1120_v63 = vld [vmem:[%s4180_s5 + $0x28] sm:$0xff]  ;;  %v837_v0 = vld [vmem:[%s3332_s26 + $0x18] sm:$0xff]  ;;  %v838_v2 = vld [vmem:[%s3332_s26 + $0x20] sm:$0xff] }
 0x158   : > { %2826 = vmatprep.subr.bf16.mxu0 %v2825_v53  ;;  %2937 = vmatprep.subr.bf16.mxu1 %v2829_v60  ;;  %v2837_v3 = vpack.c.bf16 %v1120_v63, %v1119_v62  ;;  %v1121_v5 = vld [vmem:[%s4180_s5 + $0x30] sm:$0xff]  ;;  %v1122_v6 = vld [vmem:[%s4180_s5 + $0x38] sm:$0xff]  ;;  %v839_v57 = vld [vmem:[%s3332_s26 + $0x28] sm:$0xff] }
 0x159   : > { %2945 = vmatpush3.bf16.msra.mxu1 %v2829_v60  ;;  %v840_v49 = vld [vmem:[%s3332_s26 + $0x30] sm:$0xff]  ;;  %v2841_v7 = vpack.c.bf16 %v1122_v6, %v1121_v5  ;;  %v1123_v9 = vld [vmem:[%s4180_s5 + $0x40] sm:$0xff]  ;;  %v1124_v10 = vld [vmem:[%s4180_s5 + $0x48] sm:$0xff] }
 0x15a   : > { %2938 = vmatprep.subr.bf16.mxu1 %v2833_v59  ;;  %v841_v11 = vld [vmem:[%s3332_s26 + $0x38] sm:$0xff]  ;;  %v842_v8 = vld [vmem:[%s3332_s26 + $0x40] sm:$0xff]  ;;  %v2845_v12 = vpack.c.bf16 %v1124_v10, %v1123_v9  ;;  %v1125_v13 = vld [vmem:[%s4180_s5 + $0x50] sm:$0xff] }
 0x15b   : > { %2828 = vmatpush3.bf16.msra.mxu0 %v2825_v53  ;;  %v1126_v14 = vld [vmem:[%s4180_s5 + $0x58] sm:$0xff]  ;;  %v843_v15 = vld [vmem:[%s3332_s26 + $0x48] sm:$0xff]  ;;  %v844_v16 = vld [vmem:[%s3332_s26 + $0x50] sm:$0xff] }
 0x15c   : > { %2830 = vmatprep.subr.bf16.mxu0 %v2829_v60  ;;  %v2849_v4 = vpack.c.bf16 %v1126_v14, %v1125_v13  ;;  %v845_v17 = vld [vmem:[%s3332_s26 + $0x58] sm:$0xff]  ;;  %v846_v35 = vld [vmem:[%s3332_s26 + $0x60] sm:$0xff]  ;;  %v847_v36 = vld [vmem:[%s3332_s26 + $0x68] sm:$0xff] }
 0x15d   : > { %2946 = vmatpush3.bf16.msra.mxu1 %v2833_v59  ;;  %v848_v37 = vld [vmem:[%s3332_s26 + $0x70] sm:$0xff]  ;;  %v849_v39 = vld [vmem:[%s3332_s26 + $0x78] sm:$0xff]  ;;  %v1127_v40 = vld [vmem:[%s4180_s5 + $0x60] sm:$0xff] }
 0x15e   : > { %2590 = vmatmul.mubr.msk.f32.vlgmr.msra.gmra.mrb[0].mxu0 %vm861_vm15, %v835_v55  ;;  %2939 = vmatprep.subr.bf16.mxu1 %v2837_v3  ;;  %v1128_v41 = vld [vmem:[%s4180_s5 + $0x68] sm:$0xff]  ;;  %v1129_v43 = vld [vmem:[%s4180_s5 + $0x70] sm:$0xff]  ;;  %v1130_v38 = vld [vmem:[%s4180_s5 + $0x78] sm:$0xff] }
 0x15f   : > { %2592 = vmatprep.mubr.msk.f32.mxu0 %vm861_vm15, %v836_v61  ;;  %2832 = vmatpush3.bf16.msra.mxu0 %v2829_v60  ;;  %v2853_v42 = vpack.c.bf16 %v1128_v41, %v1127_v40  ;;  %v2857_v44 = vpack.c.bf16 %v1130_v38, %v1129_v43  ;;  %v820_v45 = vld [vmem:[#allocation2] sm:$0x1]  ;;  %v822_v47 = vld [vmem:[#allocation3] sm:$0x1]  ;;  %v1074_v60 = vsub.s32 0, %v3319_v1 }
 0x160   : > { %2834 = vmatprep.subr.bf16.mxu0 %v2833_v59  ;;  %v821_v46 = vmul.f32 0.005, %v820_v45  ;;  %v823_v48 = vmul.f32 0.005, %v822_v47  ;;  %v827_v34 = vld [vmem:[%s4178_s3] sm:$0x1] }
 0x161   : > { %2947 = vmatpush3.bf16.msra.mxu1 %v2837_v3  ;;  %v831_v55 = vld [vmem:[%s4179_s4] sm:$0x1] }
 0x162   : > { %2593 = vmatmul.mubr.msk.f32.gmra.mrb[2].mxu0 %vm861_vm15, %v837_v0  ;;  %2940 = vmatprep.subr.bf16.mxu1 %v2841_v7  ;;  %v824_v50 = vmul.f32 %v821_v46, %v821_v46  ;;  %v3596_v61 = vld [vmem:[%s4177_s2] ss:$0 sm:$0xff] }
 0x163   : > { %2595 = vmatprep.mubr.msk.f32.mxu0 %vm861_vm15, %v838_v2  ;;  %2836 = vmatpush3.bf16.msra.mxu0 %v2833_v59 }
 0x164   : > { %2838 = vmatprep.subr.bf16.mxu0 %v2837_v3  ;;  %v825_v51 = vsub.f32 %v823_v48, %v824_v50 }
 0x165   : > { %2948 = vmatpush3.bf16.msra.mxu1 %v2841_v7 }
 0x166   : > { %2596 = vmatmul.mubr.msk.f32.gmra.mrb[4].mxu0 %vm861_vm15, %v839_v57  ;;  %2941 = vmatprep.subr.bf16.mxu1 %v2845_v12  ;;  %v826_v52 = vmax.f32 %v825_v51, 0.0 }
 0x167   : > { %2598 = vmatprep.mubr.msk.f32.mxu0 %vm861_vm15, %v840_v49  ;;  %2840 = vmatpush3.bf16.msra.mxu0 %v2837_v3 }
 0x168   : > { %2842 = vmatprep.subr.bf16.mxu0 %v2841_v7  ;;  %v828_v53 = vadd.f32 1e-05, %v826_v52 }
 0x169   : > { %2949 = vmatpush3.bf16.msra.mxu1 %v2845_v12 }
 0x16a   : > { %2599 = vmatmul.mubr.msk.f32.gmra.mrb[6].mxu0 %vm861_vm15, %v841_v11  ;;  %2942 = vmatprep.subr.bf16.mxu1 %v2849_v4  ;;  %3044 = vrsqrt.f32 %v828_v53 }
 0x16b   : > { %2601 = vmatprep.mubr.msk.f32.mxu0 %vm861_vm15, %v842_v8  ;;  %2844 = vmatpush3.bf16.msra.mxu0 %v2841_v7 }
 0x16c   : > { %2846 = vmatprep.subr.bf16.mxu0 %v2845_v12 }
 0x16d   : > { %2950 = vmatpush3.bf16.msra.mxu1 %v2849_v4 }
 0x16e   : > { %2602 = vmatmul.mubr.msk.f32.gmra.mrb[8].mxu0 %vm861_vm15, %v843_v15  ;;  %2943 = vmatprep.subr.bf16.mxu1 %v2853_v42 }
 0x16f   : > { %2604 = vmatprep.mubr.msk.f32.mxu0 %vm861_vm15, %v844_v16  ;;  %2848 = vmatpush3.bf16.msra.mxu0 %v2845_v12 }
 0x170   : > { %2850 = vmatprep.subr.bf16.mxu0 %v2849_v4 }
 0x171   : > { %2951 = vmatpush3.bf16.msra.mxu1 %v2853_v42 }
 0x172   : > { %2605 = vmatmul.mubr.msk.f32.gmra.mrb[10].mxu0 %vm861_vm15, %v845_v17  ;;  %2944 = vmatprep.subr.bf16.mxu1 %v2857_v44 }
 0x173   : > { %2607 = vmatprep.mubr.msk.f32.mxu0 %vm861_vm15, %v846_v35  ;;  %2852 = vmatpush3.bf16.msra.mxu0 %v2849_v4 }
 0x174   : > { %2854 = vmatprep.subr.bf16.mxu0 %v2853_v42  ;;  %v3045_v54 = vpop.eup %3044 }
 0x175   : > { %2952 = vmatpush3.bf16.msra.mxu1 %v2857_v44  ;;  %v830_v56 = vmul.f32 %v3045_v54, %v827_v34 }
 0x176   : > { %2608 = vmatmul.mubr.msk.f32.gmra.mrb[12].mxu0 %vm861_vm15, %v847_v36 }
 0x177   : > { %2610 = vmatprep.mubr.msk.f32.mxu0 %vm861_vm15, %v848_v37  ;;  %2856 = vmatpush3.bf16.msra.mxu0 %v2853_v42  ;;  %v832_v58 = vmul.f32 %v830_v56, %v821_v46  ;;  %v3599_v0 = vrot.slane %v830_v56, %v1074_v60 }
 0x178   : > { %2858 = vmatprep.subr.bf16.mxu0 %v2857_v44 }
 0x179   : > { %v833_v59 = vsub.f32 %v831_v55, %v832_v58 }
 0x17a   : > { %2611 = vmatmul.mubr.msk.f32.gmra.mrb[14].mxu0 %vm861_vm15, %v849_v39 }
 0x17b   : > { %2860 = vmatpush3.bf16.msra.mxu0 %v2857_v44  ;;  %v3602_v6 = vrot.slane %v833_v59, %v1074_v60 }
 0x231   : > { %v2591_v62 = vpop.f32.mrb[0].mxu0 }
 0x232   : > { %v982_v63 = vadd.f32 %v2591_v62, %v3596_v61  ;;  %v976_v2 = vpop.f32.mrb[1].mxu0 }
 0x233   : > { %v977_v3 = vadd.f32 %v3596_v61, %v976_v2 }
 0x234   : > { %v1056_v5 = vmax.f32 %v982_v63, 0.0 }
 0x235   : > { %v1055_v57 = vmax.f32 %v977_v3, 0.0  ;;  %v2594_v49 = vpop.f32.mrb[2].mxu0 }
 0x236   : > { %v1078_v7 = vmul.f32 %v3599_v0, %v1056_v5  ;;  %v992_v9 = vadd.f32 %v2594_v49, %v3596_v61  ;;  %v986_v10 = vpop.f32.mrb[3].mxu0 }
 0x237   : > { %v1077_v11 = vmul.f32 %v3599_v0, %v1055_v57  ;;  %v987_v8 = vadd.f32 %v3596_v61, %v986_v10 }
 0x238   : > { %v1058_v12 = vmax.f32 %v992_v9, 0.0  ;;  %v1100_v16 = vadd.f32 %v3602_v6, %v1078_v7 }
 0x239   : > { %v1057_v13 = vmax.f32 %v987_v8, 0.0  ;;  %v2597_v14 = vpop.f32.mrb[4].mxu0  ;;  %v1099_v15 = vadd.f32 %v3602_v6, %v1077_v11 }
 0x23a   : > { %v1080_v4 = vmul.f32 %v3599_v0, %v1058_v12  ;;  %v1002_v17 = vadd.f32 %v2597_v14, %v3596_v61  ;;  %v996_v35 = vpop.f32.mrb[5].mxu0 }
 0x23b   : > { %v1079_v36 = vmul.f32 %v3599_v0, %v1057_v13  ;;  %v997_v37 = vadd.f32 %v3596_v61, %v996_v35  ;;  %2645 = vmatprep.mubr.f32.mxu0 %v1099_v15 }
 0x23c   : > { %v1060_v39 = vmax.f32 %v1002_v17, 0.0  ;;  %2646 = vmatmul.mubr.f32.vlgmr.msra.gmra.mrb[16].mxu0 %v1100_v16  ;;  %v1102_v45 = vadd.f32 %v3602_v6, %v1080_v4 }
 0x23d   : > { %v1059_v40 = vmax.f32 %v997_v37, 0.0  ;;  %v2600_v41 = vpop.f32.mrb[6].mxu0  ;;  %v1101_v42 = vadd.f32 %v3602_v6, %v1079_v36 }
 0x23e   : > { %v1082_v43 = vmul.f32 %v3599_v0, %v1060_v39  ;;  %v1012_v38 = vadd.f32 %v2600_v41, %v3596_v61  ;;  %v1006_v44 = vpop.f32.mrb[7].mxu0 }
 0x23f   : > { %v1081_v46 = vmul.f32 %v3599_v0, %v1059_v40  ;;  %v1007_v47 = vadd.f32 %v3596_v61, %v1006_v44  ;;  %2648 = vmatprep.mubr.f32.mxu0 %v1101_v42 }
 0x240   : > { %v1062_v48 = vmax.f32 %v1012_v38, 0.0  ;;  %2649 = vmatmul.mubr.f32.gmra.mrb[18].mxu0 %v1102_v45  ;;  %v1104_v56 = vadd.f32 %v3602_v6, %v1082_v43 }
 0x241   : > { %v1061_v50 = vmax.f32 %v1007_v47, 0.0  ;;  %v2603_v51 = vpop.f32.mrb[8].mxu0  ;;  %v1103_v52 = vadd.f32 %v3602_v6, %v1081_v46 }
 0x242   : > { %v1084_v53 = vmul.f32 %v3599_v0, %v1062_v48  ;;  %v1022_v54 = vadd.f32 %v2603_v51, %v3596_v61  ;;  %v1016_v34 = vpop.f32.mrb[9].mxu0 }
 0x243   : > { %v1017_v58 = vadd.f32 %v3596_v61, %v1016_v34  ;;  %2651 = vmatprep.mubr.f32.mxu0 %v1103_v52  ;;  %v1083_v55 = vmul.f32 %v3599_v0, %v1061_v50 }
 0x244   : > { %v1064_v60 = vmax.f32 %v1022_v54, 0.0  ;;  %2652 = vmatmul.mubr.f32.gmra.mrb[20].mxu0 %v1104_v56  ;;  %v1106_v57 = vadd.f32 %v3602_v6, %v1084_v53 }
 0x245   : > { %v1063_v59 = vmax.f32 %v1017_v58, 0.0  ;;  %v2606_v62 = vpop.f32.mrb[10].mxu0  ;;  %v1105_v63 = vadd.f32 %v3602_v6, %v1083_v55 }
 0x246   : > { %v1086_v2 = vmul.f32 %v3599_v0, %v1064_v60  ;;  %v1032_v3 = vadd.f32 %v2606_v62, %v3596_v61  ;;  %v1026_v5 = vpop.f32.mrb[11].mxu0 }
 0x247   : > { %v1085_v49 = vmul.f32 %v3599_v0, %v1063_v59  ;;  %v1027_v7 = vadd.f32 %v3596_v61, %v1026_v5  ;;  %2654 = vmatprep.mubr.f32.mxu1 %v1105_v63 }
 0x248   : > { %v1066_v9 = vmax.f32 %v1032_v3, 0.0  ;;  %2655 = vmatmul.mubr.f32.vlgmr.msra.gmra.mrb[0].mxu1 %v1106_v57  ;;  %v1108_v15 = vadd.f32 %v3602_v6, %v1086_v2 }
 0x249   : > { %v1065_v10 = vmax.f32 %v1027_v7, 0.0  ;;  %v2609_v11 = vpop.f32.mrb[12].mxu0  ;;  %v1107_v8 = vadd.f32 %v3602_v6, %v1085_v49 }
 0x24a   : > { %v1088_v12 = vmul.f32 %v3599_v0, %v1066_v9  ;;  %v1042_v13 = vadd.f32 %v2609_v11, %v3596_v61  ;;  %v1036_v14 = vpop.f32.mrb[13].mxu0 }
 0x24b   : > { %v1087_v16 = vmul.f32 %v3599_v0, %v1065_v10  ;;  %v1037_v4 = vadd.f32 %v3596_v61, %v1036_v14  ;;  %2657 = vmatprep.mubr.f32.mxu1 %v1107_v8 }
 0x24c   : > { %v1068_v17 = vmax.f32 %v1042_v13, 0.0  ;;  %2658 = vmatmul.mubr.f32.gmra.mrb[2].mxu1 %v1108_v15  ;;  %v1110_v42 = vadd.f32 %v3602_v6, %v1088_v12 }
 0x24d   : > { %v1067_v35 = vmax.f32 %v1037_v4, 0.0  ;;  %v2612_v36 = vpop.f32.mrb[14].mxu0  ;;  %v1109_v37 = vadd.f32 %v3602_v6, %v1087_v16 }
 0x24e   : > { %v1090_v39 = vmul.f32 %v3599_v0, %v1068_v17  ;;  %v1052_v40 = vadd.f32 %v2612_v36, %v3596_v61  ;;  %v1046_v41 = vpop.f32.mrb[15].mxu0 }
 0x24f   : > { %v1089_v43 = vmul.f32 %v3599_v0, %v1067_v35  ;;  %v1047_v38 = vadd.f32 %v3596_v61, %v1046_v41  ;;  %2660 = vmatprep.mubr.f32.mxu1 %v1109_v37  ;;  %v3653_v61 = vld [vmem:[%s4181_s6] ss:$0 sm:$0xff] }
 0x250   : > { %v1070_v44 = vmax.f32 %v1052_v40, 0.0  ;;  %2661 = vmatmul.mubr.f32.gmra.mrb[4].mxu1 %v1110_v42  ;;  %v1112_v48 = vadd.f32 %v3602_v6, %v1090_v39 }
 0x251   : > { %v1069_v45 = vmax.f32 %v1047_v38, 0.0  ;;  %v1111_v46 = vadd.f32 %v3602_v6, %v1089_v43 }
 0x252   : > { %v1092_v47 = vmul.f32 %v3599_v0, %v1070_v44 }
 0x253   : > { %v1091_v50 = vmul.f32 %v3599_v0, %v1069_v45  ;;  %2663 = vmatprep.mubr.f32.mxu1 %v1111_v46 }
 0x254   : > { %2664 = vmatmul.mubr.f32.gmra.mrb[6].mxu1 %v1112_v48  ;;  %v1114_v52 = vadd.f32 %v3602_v6, %v1092_v47 }
 0x255   : > { %v1113_v51 = vadd.f32 %v3602_v6, %v1091_v50 }
 0x257   : > { %2666 = vmatprep.mubr.f32.mxu1 %v1113_v51 }
 0x258   : > { %2667 = vmatmul.mubr.f32.gmra.mrb[8].mxu1 %v1114_v52 }
 0x30f   : > { %v2647_v53 = vpop.f32.mrb[16].mxu0 }
 0x310   : > { %v1210_v54 = vadd.f32 %v2647_v53, %v3653_v61  ;;  %v1204_v34 = vpop.f32.mrb[17].mxu0 }
 0x311   : > { %v1205_v56 = vadd.f32 %v3653_v61, %v1204_v34 }
 0x312   : > { %v1284_v0 = vmax.f32 %v1210_v54, 0.0 }
 0x313   : > { %v1283_v58 = vmax.f32 %v1205_v56, 0.0  ;;  %v2650_v55 = vpop.f32.mrb[18].mxu0 }
 0x314   : > { %v1332_v60 = vsel %vm436_vm1, %v1284_v0, 0.0  ;;  %v1220_v6 = vadd.f32 %v2650_v55, %v3653_v61  ;;  %v1214_v59 = vpop.f32.mrb[19].mxu0 }
 0x315   : > { %v1373_v62 = vmul.f32 %v1332_v60, %v1332_v60  ;;  %v1331_v63 = vsel %vm435_vm0, %v1283_v58, 0.0  ;;  %v1215_v2 = vadd.f32 %v3653_v61, %v1214_v59  ;;  %vm4198_vm0 = vcmp.lt.s32.totalorder %v3372_v33, 200 }
 0x316   : > { %v1348_v3 = vadd.f32 %v1332_v60, %v1331_v63  ;;  %v1372_v5 = vmul.f32 %v1331_v63, %v1331_v63  ;;  %v1286_v57 = vmax.f32 %v1220_v6, 0.0 }
 0x317   : > { %v1285_v49 = vmax.f32 %v1215_v2, 0.0  ;;  %v2653_v7 = vpop.f32.mrb[20].mxu0 }
 0x318   : > { %v1388_v9 = vadd.f32 %v1373_v62, %v1372_v5  ;;  %v1230_v10 = vadd.f32 %v2653_v7, %v3653_v61  ;;  %v1224_v11 = vpop.f32.mrb[21].mxu0  ;;  %v1334_v19 = vsel %vm438_vm3, %v1286_v57, 0.0 }
 0x319   : > { %v1333_v8 = vsel %vm437_vm2, %v1285_v49, 0.0  ;;  %v1225_v18 = vadd.f32 %v3653_v61, %v1224_v11  ;;  %v1375_v4 = vmul.f32 %v1334_v19, %v1334_v19 }
 0x31a   : > { %v1349_v12 = vadd.f32 %v1348_v3, %v1333_v8  ;;  %v1374_v13 = vmul.f32 %v1333_v8, %v1333_v8  ;;  %v1288_v14 = vmax.f32 %v1230_v10, 0.0 }
 0x31b   : > { %v1287_v15 = vmax.f32 %v1225_v18, 0.0  ;;  %v2656_v16 = vpop.f32.mrb[0].mxu1 }
 0x31c   : > { %v1389_v17 = vadd.f32 %v1388_v9, %v1374_v13  ;;  %v1350_v35 = vadd.f32 %v1349_v12, %v1334_v19  ;;  %v1240_v36 = vadd.f32 %v2656_v16, %v3653_v61  ;;  %v1234_v37 = vpop.f32.mrb[1].mxu1  ;;  %v1336_v21 = vsel %vm440_vm5, %v1288_v14, 0.0 }
 0x31d   : > { %v1335_v20 = vsel %vm439_vm4, %v1287_v15, 0.0  ;;  %v1235_v39 = vadd.f32 %v3653_v61, %v1234_v37  ;;  %v1377_v45 = vmul.f32 %v1336_v21, %v1336_v21 }
 0x31e   : > { %v1351_v40 = vadd.f32 %v1350_v35, %v1335_v20  ;;  %v1376_v41 = vmul.f32 %v1335_v20, %v1335_v20  ;;  %v1390_v42 = vadd.f32 %v1389_v17, %v1375_v4  ;;  %v1290_v43 = vmax.f32 %v1240_v36, 0.0 }
 0x31f   : > { %v1289_v38 = vmax.f32 %v1235_v39, 0.0  ;;  %v2659_v44 = vpop.f32.mrb[2].mxu1 }
 0x320   : > { %v1391_v46 = vadd.f32 %v1390_v42, %v1376_v41  ;;  %v1352_v47 = vadd.f32 %v1351_v40, %v1336_v21  ;;  %v1250_v48 = vadd.f32 %v2659_v44, %v3653_v61  ;;  %v1244_v50 = vpop.f32.mrb[3].mxu1  ;;  %v1338_v23 = vsel %vm442_vm7, %v1290_v43, 0.0 }
 0x321   : > { %v1337_v22 = vsel %vm441_vm6, %v1289_v38, 0.0  ;;  %v1245_v51 = vadd.f32 %v3653_v61, %v1244_v50  ;;  %v1379_v58 = vmul.f32 %v1338_v23, %v1338_v23 }
 0x322   : > { %v1353_v52 = vadd.f32 %v1352_v47, %v1337_v22  ;;  %v1378_v53 = vmul.f32 %v1337_v22, %v1337_v22  ;;  %v1392_v54 = vadd.f32 %v1391_v46, %v1377_v45  ;;  %v1292_v34 = vmax.f32 %v1250_v48, 0.0 }
 0x323   : > { %v1291_v56 = vmax.f32 %v1245_v51, 0.0  ;;  %v2662_v0 = vpop.f32.mrb[4].mxu1 }
 0x324   : > { %v1393_v55 = vadd.f32 %v1392_v54, %v1378_v53  ;;  %v1354_v60 = vadd.f32 %v1353_v52, %v1338_v23  ;;  %v1260_v6 = vadd.f32 %v2662_v0, %v3653_v61  ;;  %v1254_v59 = vpop.f32.mrb[5].mxu1  ;;  %v1340_v25 = vsel %vm444_vm9, %v1292_v34, 0.0 }
 0x325   : > { %v1339_v24 = vsel %vm443_vm8, %v1291_v56, 0.0  ;;  %v1255_v62 = vadd.f32 %v3653_v61, %v1254_v59  ;;  %v1381_v7 = vmul.f32 %v1340_v25, %v1340_v25 }
 0x326   : > { %v1355_v63 = vadd.f32 %v1354_v60, %v1339_v24  ;;  %v1380_v2 = vmul.f32 %v1339_v24, %v1339_v24  ;;  %v1394_v3 = vadd.f32 %v1393_v55, %v1379_v58  ;;  %v1294_v5 = vmax.f32 %v1260_v6, 0.0  ;;  %v1347_v58 = vld [vmem:[#allocation4] sm:$0x1]  ;;  %v1371_v60 = vld [vmem:[#allocation5] sm:$0x1] }
 0x327   : > { %v1293_v57 = vmax.f32 %v1255_v62, 0.0  ;;  %v2665_v49 = vpop.f32.mrb[6].mxu1 }
 0x328   : > { %v1395_v9 = vadd.f32 %v1394_v3, %v1380_v2  ;;  %v1356_v10 = vadd.f32 %v1355_v63, %v1340_v25  ;;  %v1270_v11 = vadd.f32 %v2665_v49, %v3653_v61  ;;  %v1264_v19 = vpop.f32.mrb[7].mxu1  ;;  %v1342_v27 = vsel %vm446_vm11, %v1294_v5, 0.0 }
 0x329   : > { %v1341_v26 = vsel %vm445_vm10, %v1293_v57, 0.0  ;;  %v1265_v8 = vadd.f32 %v3653_v61, %v1264_v19  ;;  %v1383_v4 = vmul.f32 %v1342_v27, %v1342_v27 }
 0x32a   : > { %v1357_v18 = vadd.f32 %v1356_v10, %v1341_v26  ;;  %v1382_v12 = vmul.f32 %v1341_v26, %v1341_v26  ;;  %v1396_v13 = vadd.f32 %v1395_v9, %v1381_v7  ;;  %v1296_v14 = vmax.f32 %v1270_v11, 0.0 }
 0x32b   : > { %v1295_v15 = vmax.f32 %v1265_v8, 0.0  ;;  %v2668_v16 = vpop.f32.mrb[8].mxu1 }
 0x32c   : > { %v1397_v17 = vadd.f32 %v1396_v13, %v1382_v12  ;;  %v1358_v35 = vadd.f32 %v1357_v18, %v1342_v27  ;;  %v1280_v36 = vadd.f32 %v2668_v16, %v3653_v61  ;;  %v1274_v37 = vpop.f32.mrb[9].mxu1  ;;  %v1344_v29 = vsel %vm448_vm13, %v1296_v14, 0.0 }
 0x32d   : > { %v1343_v28 = vsel %vm447_vm12, %v1295_v15, 0.0  ;;  %v1275_v21 = vadd.f32 %v3653_v61, %v1274_v37  ;;  %v1385_v43 = vmul.f32 %v1344_v29, %v1344_v29 }
 0x32e   : > { %v1359_v20 = vadd.f32 %v1358_v35, %v1343_v28  ;;  %v1384_v39 = vmul.f32 %v1343_v28, %v1343_v28  ;;  %v1398_v40 = vadd.f32 %v1397_v17, %v1383_v4  ;;  %v1298_v41 = vmax.f32 %v1280_v36, 0.0 }
 0x32f   : > { %v1297_v42 = vmax.f32 %v1275_v21, 0.0 }
 0x330   : > { %v1399_v38 = vadd.f32 %v1398_v40, %v1384_v39  ;;  %v1360_v44 = vadd.f32 %v1359_v20, %v1344_v29  ;;  %v1346_v45 = vsel %vm4198_vm0, %v1298_v41, 0.0 }
 0x331   : > { %v1345_v31 = vsel %vm449_vm14, %v1297_v42, 0.0  ;;  %v1387_v48 = vmul.f32 %v1346_v45, %v1346_v45 }
 0x332   : > { %v1361_v46 = vadd.f32 %v1360_v44, %v1345_v31  ;;  %v1386_v47 = vmul.f32 %v1345_v31, %v1345_v31  ;;  %v1400_v30 = vadd.f32 %v1399_v38, %v1385_v43 }
 0x334   : > { %v1362_v50 = vadd.f32 %v1361_v46, %v1346_v45  ;;  %v1401_v61 = vadd.f32 %v1400_v30, %v1386_v47 }
 0x336   : > { %v1363_v23 = vrot.slane %v1362_v50, 4  ;;  %v1402_v22 = vadd.f32 %v1401_v61, %v1387_v48 }
 0x338   : > { %v1364_v51 = vadd.f32 %v1363_v23, %v1362_v50  ;;  %v1403_v52 = vrot.slane %v1402_v22, 4 }
 0x33a   : > { %v1365_v53 = vrot.slane %v1364_v51, 2  ;;  %v1404_v54 = vadd.f32 %v1403_v52, %v1402_v22 }
 0x33c   : > { %v1366_v34 = vadd.f32 %v1365_v53, %v1364_v51  ;;  %v1405_v56 = vrot.slane %v1404_v54, 2 }
 0x33e   : > { %v1367_v0 = vrot.slane %v1366_v34, 1  ;;  %v1406_v33 = vadd.f32 %v1405_v56, %v1404_v54 }
 0x340   : > { %v1368_v55 = vadd.f32 %v1367_v0, %v1366_v34  ;;  %v1407_v32 = vrot.slane %v1406_v33, 1 }
 0x342   : > { %v1369_v6 = vadd.f32 %v1368_v55, %v1347_v58  ;;  %v1408_v59 = vadd.f32 %v1407_v32, %v1406_v33 }
 0x344   : > { %1370 = vst [vmem:[#allocation4] sm:$0x1] %v1369_v6  ;;  %v1409_v25 = vadd.f32 %v1408_v59, %v1371_v60 }
 0x346   : > { %1410 = vst [vmem:[#allocation5] sm:$0x1] %v1409_v25 }
 0x347 PF: > { %p2367_p4 = scmp.ne.s32.totalorder %s3164_s21, 2 }
 0x348   : > { %v1445_v24 = vld [vmem:[%s4176_s1] sm:$0xff] (!%p2367_p4)  ;;  %v1446_v62 = vld [vmem:[%s4176_s1 + $0x8] sm:$0xff] (!%p2367_p4)  ;;  %v1447_v63 = vld [vmem:[%s4176_s1 + $0x10] sm:$0xff] (!%p2367_p4)  ;;  %vm1456_vm1 = vcmask (!%p2367_p4), 261120  }
 0x349   : > { %1414 = sbr.rel (%p2367_p4) target bundleno = 1701 (0x6a5), region = 84  ;;  %v2861_v2 = vpack.c.bf16 (!%p2367_p4), %v1446_v62, %v1445_v24  ;;  %v1448_v3 = vld [vmem:[%s4176_s1 + $0x18] sm:$0xff] (!%p2367_p4)  ;;  %v1429_v5 = vld [vmem:[%s3332_s26] sm:$0xff] (!%p2367_p4)  ;;  %v1725_v7 = vld [vmem:[%s4180_s5 + $0x8] sm:$0xff] (!%p2367_p4) }
 0x34a   : > { %v2865_v57 = vpack.c.bf16 (!%p2367_p4), %v1448_v3, %v1447_v63  ;;  %2677 = vmatprep.mubr.msk.f32.mxu0 (!%p2367_p4), %vm1456_vm1, %v1429_v5  ;;  %v1724_v49 = vld [vmem:[%s4180_s5] sm:$0xff] (!%p2367_p4)  ;;  %v1726_v9 = vld [vmem:[%s4180_s5 + $0x10] sm:$0xff] (!%p2367_p4)  ;;  %v1727_v10 = vld [vmem:[%s4180_s5 + $0x18] sm:$0xff] (!%p2367_p4) }
 0x34b   : > { %2862 = vmatprep.subr.bf16.mxu0 (!%p2367_p4), %v2861_v2  ;;  %v1430_v11 = vld [vmem:[%s3332_s26 + $0x8] sm:$0xff] (!%p2367_p4)  ;;  %v2869_v19 = vpack.c.bf16 (!%p2367_p4), %v1725_v7, %v1724_v49  ;;  %v2873_v27 = vpack.c.bf16 (!%p2367_p4), %v1727_v10, %v1726_v9  ;;  %v1431_v26 = vld [vmem:[%s3332_s26 + $0x10] sm:$0xff] (!%p2367_p4)  ;;  %v1728_v8 = vld [vmem:[%s4180_s5 + $0x20] sm:$0xff] (!%p2367_p4) }
 0x34c   : > { %2864 = vmatpush3.bf16.msra.mxu0 (!%p2367_p4), %v2861_v2  ;;  %v1729_v18 = vld [vmem:[%s4180_s5 + $0x28] sm:$0xff] (!%p2367_p4)  ;;  %v1432_v12 = vld [vmem:[%s3332_s26 + $0x18] sm:$0xff] (!%p2367_p4)  ;;  %v1433_v14 = vld [vmem:[%s3332_s26 + $0x20] sm:$0xff] (!%p2367_p4) }
 0x34d   : > { %2866 = vmatprep.subr.bf16.mxu0 (!%p2367_p4), %v2865_v57  ;;  %2870 = vmatprep.subr.bf16.mxu1 (!%p2367_p4), %v2869_v19  ;;  %v2877_v13 = vpack.c.bf16 (!%p2367_p4), %v1729_v18, %v1728_v8  ;;  %v1730_v15 = vld [vmem:[%s4180_s5 + $0x30] sm:$0xff] (!%p2367_p4)  ;;  %v1731_v16 = vld [vmem:[%s4180_s5 + $0x38] sm:$0xff] (!%p2367_p4)  ;;  %v1434_v4 = vld [vmem:[%s3332_s26 + $0x28] sm:$0xff] (!%p2367_p4) }
 0x34e   : > { %2872 = vmatpush3.bf16.msra.mxu1 (!%p2367_p4), %v2869_v19  ;;  %v2881_v17 = vpack.c.bf16 (!%p2367_p4), %v1731_v16, %v1730_v15  ;;  %v1435_v35 = vld [vmem:[%s3332_s26 + $0x30] sm:$0xff] (!%p2367_p4)  ;;  %v1732_v36 = vld [vmem:[%s4180_s5 + $0x40] sm:$0xff] (!%p2367_p4)  ;;  %v1733_v37 = vld [vmem:[%s4180_s5 + $0x48] sm:$0xff] (!%p2367_p4) }
 0x34f   : > { %2874 = vmatprep.subr.bf16.mxu1 (!%p2367_p4), %v2873_v27  ;;  %v1436_v29 = vld [vmem:[%s3332_s26 + $0x38] sm:$0xff] (!%p2367_p4)  ;;  %v2885_v28 = vpack.c.bf16 (!%p2367_p4), %v1733_v37, %v1732_v36  ;;  %v1437_v21 = vld [vmem:[%s3332_s26 + $0x40] sm:$0xff] (!%p2367_p4)  ;;  %v1734_v20 = vld [vmem:[%s4180_s5 + $0x50] sm:$0xff] (!%p2367_p4) }
 0x350   : > { %2868 = vmatpush3.bf16.msra.mxu0 %v2865_v57  ;;  %v1735_v39 = vld [vmem:[%s4180_s5 + $0x58] sm:$0xff]  ;;  %v1438_v40 = vld [vmem:[%s3332_s26 + $0x48] sm:$0xff]  ;;  %v1439_v42 = vld [vmem:[%s3332_s26 + $0x50] sm:$0xff] }
 0x351   : > { %v2889_v41 = vpack.c.bf16 %v1735_v39, %v1734_v20  ;;  %v1440_v43 = vld [vmem:[%s3332_s26 + $0x58] sm:$0xff]  ;;  %v1441_v38 = vld [vmem:[%s3332_s26 + $0x60] sm:$0xff]  ;;  %v1442_v44 = vld [vmem:[%s3332_s26 + $0x68] sm:$0xff] }
 0x352   : > { %2876 = vmatpush3.bf16.msra.mxu1 %v2873_v27  ;;  %v1443_v45 = vld [vmem:[%s3332_s26 + $0x70] sm:$0xff]  ;;  %v1444_v31 = vld [vmem:[%s3332_s26 + $0x78] sm:$0xff]  ;;  %v1736_v46 = vld [vmem:[%s4180_s5 + $0x60] sm:$0xff]  ;;  %v3861_v27 = vsub.s32 0, %v3319_v1 }
 0x353   : > { %2678 = vmatmul.mubr.msk.f32.vlgmr.msra.gmra.mrb[0].mxu0 %vm1456_vm1, %v1430_v11  ;;  %2878 = vmatprep.subr.bf16.mxu1 %v2877_v13  ;;  %v1737_v47 = vld [vmem:[%s4180_s5 + $0x68] sm:$0xff]  ;;  %v1738_v48 = vld [vmem:[%s4180_s5 + $0x70] sm:$0xff]  ;;  %v1739_v50 = vld [vmem:[%s4180_s5 + $0x78] sm:$0xff] }
 0x354   : > { %2680 = vmatprep.mubr.msk.f32.mxu0 %vm1456_vm1, %v1431_v26  ;;  %v2893_v30 = vpack.c.bf16 %v1737_v47, %v1736_v46  ;;  %v2897_v61 = vpack.c.bf16 %v1739_v50, %v1738_v48  ;;  %v1952_v23 = vld [vmem:[%s4184_s9] sm:$0xff]  ;;  %v1953_v22 = vld [vmem:[%s4184_s9 + $0x8] sm:$0xff]  ;;  %v1954_v51 = vld [vmem:[%s4184_s9 + $0x10] sm:$0xff] }
 0x355   : > { %v3805_v52 = vpack.c.bf16 %v1953_v22, %v1952_v23  ;;  %v1955_v53 = vld [vmem:[%s4184_s9 + $0x18] sm:$0xff]  ;;  %v1956_v34 = vld [vmem:[%s4184_s9 + $0x20] sm:$0xff]  ;;  %v1957_v56 = vld [vmem:[%s4184_s9 + $0x28] sm:$0xff] }
 0x356   : > { %2880 = vmatpush3.bf16.msra.mxu1 %v2877_v13  ;;  %v3810_v54 = vpack.c.bf16 %v1955_v53, %v1954_v51  ;;  %v3822_v0 = vpack.c.bf16 %v1957_v56, %v1956_v34  ;;  %v1958_v33 = vld [vmem:[%s4184_s9 + $0x30] sm:$0xff]  ;;  %v1959_v58 = vld [vmem:[%s4184_s9 + $0x38] sm:$0xff]  ;;  %v1960_v32 = vld [vmem:[%s4184_s9 + $0x40] sm:$0xff] }
 0x357   : > { %2681 = vmatmul.mubr.msk.f32.gmra.mrb[2].mxu0 %vm1456_vm1, %v1432_v12  ;;  %2882 = vmatprep.subr.bf16.mxu1 %v2881_v17  ;;  %v3832_v55 = vpack.c.bf16 %v1959_v58, %v1958_v33  ;;  %v1961_v60 = vld [vmem:[%s4184_s9 + $0x48] sm:$0xff]  ;;  %v1962_v59 = vld [vmem:[%s4184_s9 + $0x50] sm:$0xff]  ;;  %v1963_v25 = vld [vmem:[%s4184_s9 + $0x58] sm:$0xff] }
 0x358   : > { %2683 = vmatprep.mubr.msk.f32.mxu0 %vm1456_vm1, %v1433_v14  ;;  %2902 = vmatprep.subr.bf16.mxu0 %v3805_v52  ;;  %v3842_v6 = vpack.c.bf16 %v1961_v60, %v1960_v32  ;;  %v3852_v24 = vpack.c.bf16 %v1963_v25, %v1962_v59  ;;  %v1415_v62 = vld [vmem:[#allocation2] sm:$0x1]  ;;  %v1417_v2 = vld [vmem:[#allocation3] sm:$0x1] }
 0x359   : > { %2904 = vmatpush3.bf16.msra.mxu0 %v3805_v52  ;;  %v1416_v63 = vmul.f32 0.005, %v1415_v62  ;;  %v1418_v3 = vmul.f32 0.005, %v1417_v2  ;;  %v1422_v10 = vld [vmem:[%s4178_s3] sm:$0x1] }
 0x35a   : > { %2884 = vmatpush3.bf16.msra.mxu1 %v2881_v17  ;;  %2906 = vmatprep.subr.bf16.mxu0 %v3810_v54  ;;  %v1426_v26 = vld [vmem:[%s4179_s4] sm:$0x1] }
 0x35b   : > { %2684 = vmatmul.mubr.msk.f32.gmra.mrb[4].mxu0 %vm1456_vm1, %v1434_v4  ;;  %2886 = vmatprep.subr.bf16.mxu1 %v2885_v28  ;;  %v1419_v5 = vmul.f32 %v1416_v63, %v1416_v63  ;;  %v3869_v8 = vld [vmem:[%s4177_s2] ss:$0 sm:$0xff] }
 0x35c   : > { %2686 = vmatprep.mubr.msk.f32.mxu0 %vm1456_vm1, %v1435_v35 }
 0x35d   : > { %2908 = vmatpush3.bf16.msra.mxu0 %v3810_v54  ;;  %v1420_v57 = vsub.f32 %v1418_v3, %v1419_v5 }
 0x35e   : > { %2888 = vmatpush3.bf16.msra.mxu1 %v2885_v28  ;;  %2910 = vmatprep.subr.bf16.mxu0 %v3822_v0 }
 0x35f   : > { %2687 = vmatmul.mubr.msk.f32.gmra.mrb[6].mxu0 %vm1456_vm1, %v1436_v29  ;;  %2890 = vmatprep.subr.bf16.mxu1 %v2889_v41  ;;  %v1421_v49 = vmax.f32 %v1420_v57, 0.0 }
 0x360   : > { %2689 = vmatprep.mubr.msk.f32.mxu0 %vm1456_vm1, %v1437_v21 }
 0x361   : > { %2912 = vmatpush3.bf16.msra.mxu0 %v3822_v0  ;;  %v1423_v7 = vadd.f32 1e-05, %v1421_v49 }
 0x362   : > { %2892 = vmatpush3.bf16.msra.mxu1 %v2889_v41  ;;  %2914 = vmatprep.subr.bf16.mxu0 %v3832_v55 }
 0x363   : > { %2690 = vmatmul.mubr.msk.f32.gmra.mrb[8].mxu0 %vm1456_vm1, %v1438_v40  ;;  %2894 = vmatprep.subr.bf16.mxu1 %v2893_v30  ;;  %3046 = vrsqrt.f32 %v1423_v7 }
 0x364   : > { %2692 = vmatprep.mubr.msk.f32.mxu0 %vm1456_vm1, %v1439_v42 }
 0x365   : > { %2916 = vmatpush3.bf16.msra.mxu0 %v3832_v55 }
 0x366   : > { %2896 = vmatpush3.bf16.msra.mxu1 %v2893_v30  ;;  %2918 = vmatprep.subr.bf16.mxu0 %v3842_v6 }
 0x367   : > { %2693 = vmatmul.mubr.msk.f32.gmra.mrb[10].mxu0 %vm1456_vm1, %v1440_v43  ;;  %2898 = vmatprep.subr.bf16.mxu1 %v2897_v61 }
 0x368   : > { %2695 = vmatprep.mubr.msk.f32.mxu0 %vm1456_vm1, %v1441_v38 }
 0x369   : > { %2920 = vmatpush3.bf16.msra.mxu0 %v3842_v6 }
 0x36a   : > { %2900 = vmatpush3.bf16.msra.mxu1 %v2897_v61  ;;  %2922 = vmatprep.subr.bf16.mxu0 %v3852_v24 }
 0x36b   : > { %2696 = vmatmul.mubr.msk.f32.gmra.mrb[12].mxu0 %vm1456_vm1, %v1442_v44  ;;  %2953 = vmatprep.subr.bf16.mxu1 %v3805_v52 }
 0x36c   : > { %2698 = vmatprep.mubr.msk.f32.mxu0 %vm1456_vm1, %v1443_v45 }
 0x36d   : > { %2924 = vmatpush3.bf16.msra.mxu0 %v3852_v24  ;;  %v3047_v9 = vpop.eup %3046 }
 0x36e   : > { %v1425_v11 = vmul.f32 %v3047_v9, %v1422_v10 }
 0x36f   : > { %2699 = vmatmul.mubr.msk.f32.gmra.mrb[14].mxu0 %vm1456_vm1, %v1444_v31 }
 0x370   : > { %v1427_v19 = vmul.f32 %v1425_v11, %v1416_v63  ;;  %v3873_v14 = vrot.slane %v1425_v11, %v3861_v27 }
 0x372   : > { %v1428_v12 = vsub.f32 %v1426_v26, %v1427_v19 }
 0x374   : > { %v3877_v35 = vrot.slane %v1428_v12, %v3861_v27 }
 0x426   : > { %v2679_v18 = vpop.f32.mrb[0].mxu0 }
 0x427   : > { %v1577_v13 = vadd.f32 %v2679_v18, %v3869_v8  ;;  %v1571_v15 = vpop.f32.mrb[1].mxu0 }
 0x428   : > { %v1572_v1 = vadd.f32 %v3869_v8, %v1571_v15 }
 0x429   : > { %v1651_v16 = vmax.f32 %v1577_v13, 0.0 }
 0x42a   : > { %v1650_v4 = vmax.f32 %v1572_v1, 0.0  ;;  %v2682_v17 = vpop.f32.mrb[2].mxu0 }
 0x42b   : > { %v1673_v36 = vmul.f32 %v3873_v14, %v1651_v16  ;;  %v1587_v37 = vadd.f32 %v2682_v17, %v3869_v8  ;;  %v1581_v29 = vpop.f32.mrb[3].mxu0 }
 0x42c   : > { %v1582_v28 = vadd.f32 %v3869_v8, %v1581_v29  ;;  %v1672_v21 = vmul.f32 %v3873_v14, %v1650_v4 }
 0x42d   : > { %v1653_v20 = vmax.f32 %v1587_v37, 0.0  ;;  %v1695_v44 = vadd.f32 %v3877_v35, %v1673_v36 }
 0x42e   : > { %v1652_v39 = vmax.f32 %v1582_v28, 0.0  ;;  %v2685_v40 = vpop.f32.mrb[4].mxu0  ;;  %v1694_v41 = vadd.f32 %v3877_v35, %v1672_v21 }
 0x42f   : > { %v1675_v42 = vmul.f32 %v3873_v14, %v1653_v20  ;;  %v1597_v43 = vadd.f32 %v2685_v40, %v3869_v8  ;;  %v1591_v38 = vpop.f32.mrb[5].mxu0 }
 0x430   : > { %v1674_v45 = vmul.f32 %v3873_v14, %v1652_v39  ;;  %v1592_v31 = vadd.f32 %v3869_v8, %v1591_v38  ;;  %2733 = vmatprep.mubr.f32.mxu1 %v1694_v41 }
 0x431   : > { %v1655_v46 = vmax.f32 %v1597_v43, 0.0  ;;  %2734 = vmatmul.mubr.f32.vlgmr.msra.gmra.mrb[0].mxu1 %v1695_v44  ;;  %v1697_v22 = vadd.f32 %v3877_v35, %v1675_v42 }
 0x432   : > { %v1654_v47 = vmax.f32 %v1592_v31, 0.0  ;;  %v2688_v30 = vpop.f32.mrb[6].mxu0  ;;  %v1696_v48 = vadd.f32 %v3877_v35, %v1674_v45  ;;  %2961 = vmatpush3.bf16.msra.mxu1 %v3805_v52  ;;  %v1964_v45 = vld [vmem:[%s4184_s9 + $0x60] sm:$0xff] }
 0x433   : > { %v1677_v50 = vmul.f32 %v3873_v14, %v1655_v46  ;;  %v1607_v61 = vadd.f32 %v2688_v30, %v3869_v8  ;;  %v1601_v23 = vpop.f32.mrb[7].mxu0  ;;  %2954 = vmatprep.subr.bf16.mxu1 %v3810_v54 }
 0x434   : > { %v1676_v51 = vmul.f32 %v3873_v14, %v1654_v47  ;;  %v1602_v53 = vadd.f32 %v3869_v8, %v1601_v23  ;;  %2736 = vmatprep.mubr.f32.mxu1 %v1696_v48  ;;  %v1710_v47 = vld [vmem:[#allocation4] sm:$0x1]  ;;  %v1712_v48 = vld [vmem:[#allocation5] sm:$0x1] }
 0x435   : > { %v1657_v34 = vmax.f32 %v1607_v61, 0.0  ;;  %2737 = vmatmul.mubr.f32.gmra.mrb[2].mxu1 %v1697_v22  ;;  %v1699_v56 = vadd.f32 %v3877_v35, %v1677_v50  ;;  %v1711_v30 = vmul.f32 0.005, %v1710_v47  ;;  %v1713_v50 = vmul.f32 0.005, %v1712_v48 }
 0x436   : > { %v1656_v33 = vmax.f32 %v1602_v53, 0.0  ;;  %v2691_v52 = vpop.f32.mrb[8].mxu0  ;;  %v1698_v58 = vadd.f32 %v3877_v35, %v1676_v51  ;;  %2962 = vmatpush3.bf16.msra.mxu1 %v3810_v54 }
 0x437   : > { %v1679_v32 = vmul.f32 %v3873_v14, %v1657_v34  ;;  %v1617_v60 = vadd.f32 %v2691_v52, %v3869_v8  ;;  %v1611_v59 = vpop.f32.mrb[9].mxu0  ;;  %2955 = vmatprep.subr.bf16.mxu1 %v3822_v0  ;;  %v1714_v61 = vmul.f32 %v1711_v30, %v1711_v30  ;;  %v1717_v34 = vld [vmem:[%s4182_s7] sm:$0x1] }
 0x438   : > { %v1678_v25 = vmul.f32 %v3873_v14, %v1656_v33  ;;  %v1612_v62 = vadd.f32 %v3869_v8, %v1611_v59  ;;  %2739 = vmatprep.mubr.f32.mxu1 %v1698_v58  ;;  %v1721_v52 = vld [vmem:[%s4183_s8] sm:$0x1] }
 0x439   : > { %v1659_v63 = vmax.f32 %v1617_v60, 0.0  ;;  %2740 = vmatmul.mubr.f32.gmra.mrb[4].mxu1 %v1699_v56  ;;  %v1701_v2 = vadd.f32 %v3877_v35, %v1679_v32  ;;  %v1715_v23 = vsub.f32 %v1713_v50, %v1714_v61  ;;  %v3957_v58 = vld [vmem:[%s4181_s6] ss:$0 sm:$0xff] }
 0x43a   : > { %v1658_v3 = vmax.f32 %v1612_v62, 0.0  ;;  %v2694_v5 = vpop.f32.mrb[10].mxu0  ;;  %v1700_v54 = vadd.f32 %v3877_v35, %v1678_v25  ;;  %2963 = vmatpush3.bf16.msra.mxu1 %v3822_v0 }
 0x43b   : > { %v1681_v57 = vmul.f32 %v3873_v14, %v1659_v63  ;;  %v1627_v49 = vadd.f32 %v2694_v5, %v3869_v8  ;;  %v1621_v7 = vpop.f32.mrb[11].mxu0  ;;  %2956 = vmatprep.subr.bf16.mxu1 %v3832_v55  ;;  %v1716_v22 = vmax.f32 %v1715_v23, 0.0 }
 0x43c   : > { %v1680_v9 = vmul.f32 %v3873_v14, %v1658_v3  ;;  %v1622_v10 = vadd.f32 %v3869_v8, %v1621_v7  ;;  %2742 = vmatprep.mubr.f32.mxu1 %v1700_v54 }
 0x43d   : > { %v1661_v11 = vmax.f32 %v1627_v49, 0.0  ;;  %2743 = vmatmul.mubr.f32.gmra.mrb[6].mxu1 %v1701_v2  ;;  %v1703_v19 = vadd.f32 %v3877_v35, %v1681_v57  ;;  %v1718_v51 = vadd.f32 1e-05, %v1716_v22 }
 0x43e   : > { %v1660_v26 = vmax.f32 %v1622_v10, 0.0  ;;  %v2697_v18 = vpop.f32.mrb[12].mxu0  ;;  %v1702_v0 = vadd.f32 %v3877_v35, %v1680_v9  ;;  %2964 = vmatpush3.bf16.msra.mxu1 %v3832_v55 }
 0x43f   : > { %v1683_v12 = vmul.f32 %v3873_v14, %v1661_v11  ;;  %v1637_v13 = vadd.f32 %v2697_v18, %v3869_v8  ;;  %v1631_v15 = vpop.f32.mrb[13].mxu0  ;;  %2957 = vmatprep.subr.bf16.mxu1 %v3842_v6  ;;  %3048 = vrsqrt.f32 %v1718_v51 }
 0x440   : > { %v1682_v1 = vmul.f32 %v3873_v14, %v1660_v26  ;;  %v1632_v16 = vadd.f32 %v3869_v8, %v1631_v15  ;;  %2745 = vmatprep.mubr.f32.mxu1 %v1702_v0 }
 0x441   : > { %v1663_v4 = vmax.f32 %v1637_v13, 0.0  ;;  %2746 = vmatmul.mubr.f32.gmra.mrb[8].mxu1 %v1703_v19  ;;  %v1705_v17 = vadd.f32 %v3877_v35, %v1683_v12 }
 0x442   : > { %v1662_v36 = vmax.f32 %v1632_v16, 0.0  ;;  %v2700_v37 = vpop.f32.mrb[14].mxu0  ;;  %v1704_v55 = vadd.f32 %v3877_v35, %v1682_v1  ;;  %2965 = vmatpush3.bf16.msra.mxu1 %v3842_v6 }
 0x443   : > { %v1685_v29 = vmul.f32 %v3873_v14, %v1663_v4  ;;  %v1647_v28 = vadd.f32 %v2700_v37, %v3869_v8  ;;  %v1641_v21 = vpop.f32.mrb[15].mxu0  ;;  %2958 = vmatprep.subr.bf16.mxu1 %v3852_v24 }
 0x444   : > { %v1684_v20 = vmul.f32 %v3873_v14, %v1662_v36  ;;  %v1642_v39 = vadd.f32 %v3869_v8, %v1641_v21  ;;  %2748 = vmatprep.mubr.f32.mxu1 %v1704_v55 }
 0x445   : > { %v1665_v40 = vmax.f32 %v1647_v28, 0.0  ;;  %2749 = vmatmul.mubr.f32.gmra.mrb[10].mxu1 %v1705_v17  ;;  %v1707_v41 = vadd.f32 %v3877_v35, %v1685_v29 }
 0x446   : > { %v1664_v42 = vmax.f32 %v1642_v39, 0.0  ;;  %v1706_v43 = vadd.f32 %v3877_v35, %v1684_v20  ;;  %2966 = vmatpush3.bf16.msra.mxu1 %v3852_v24  ;;  %v1965_v24 = vld [vmem:[%s4184_s9 + $0x68] sm:$0xff] }
 0x447   : > { %v1687_v6 = vmul.f32 %v3873_v14, %v1665_v40  ;;  %v2925_v31 = vpack.c.bf16 %v1965_v24, %v1964_v45 }
 0x448   : > { %v1686_v38 = vmul.f32 %v3873_v14, %v1664_v42  ;;  %2751 = vmatprep.mubr.f32.mxu1 %v1706_v43  ;;  %v1966_v14 = vld [vmem:[%s4184_s9 + $0x70] sm:$0xff] }
 0x449   : > { %2752 = vmatmul.mubr.f32.gmra.mrb[12].mxu1 %v1707_v41  ;;  %v1709_v44 = vadd.f32 %v3877_v35, %v1687_v6  ;;  %2926 = vmatprep.subr.bf16.mxu0 %v2925_v31  ;;  %v3049_v53 = vpop.eup %3048 }
 0x44a   : > { %v1708_v8 = vadd.f32 %v3877_v35, %v1686_v38  ;;  %2959 = vmatprep.subr.bf16.mxu1 %v2925_v31  ;;  %2928 = vmatpush3.bf16.msra.mxu0 %v2925_v31  ;;  %v1967_v35 = vld [vmem:[%s4184_s9 + $0x78] sm:$0xff]  ;;  %v1720_v56 = vmul.f32 %v3049_v53, %v1717_v34 }
 0x44b   : > { %2967 = vmatpush3.bf16.msra.mxu1 %v2925_v31  ;;  %v2929_v46 = vpack.c.bf16 %v1967_v35, %v1966_v14 }
 0x44c   : > { %2754 = vmatprep.mubr.f32.mxu1 %v1708_v8  ;;  %v1722_v33 = vmul.f32 %v1720_v56, %v1711_v30  ;;  %v3961_v25 = vrot.slane %v1720_v56, %v3861_v27 }
 0x44d   : > { %2755 = vmatmul.mubr.f32.gmra.mrb[14].mxu1 %v1709_v44  ;;  %2930 = vmatprep.subr.bf16.mxu0 %v2929_v46 }
 0x44e   : > { %2960 = vmatprep.subr.bf16.mxu1 %v2929_v46  ;;  %2932 = vmatpush3.bf16.msra.mxu0 %v2929_v46  ;;  %v1723_v32 = vsub.f32 %v1721_v52, %v1722_v33 }
 0x44f   : > { %2968 = vmatpush3.bf16.msra.mxu1 %v2929_v46 }
 0x450   : > { %v3965_v3 = vrot.slane %v1723_v32, %v3861_v27 }
 0x504   : > { %v2735_v60 = vpop.f32.mrb[0].mxu1 }
 0x505   : > { %v1819_v59 = vadd.f32 %v2735_v60, %v3957_v58  ;;  %v1813_v62 = vpop.f32.mrb[1].mxu1 }
 0x506   : > { %v1814_v63 = vadd.f32 %v3957_v58, %v1813_v62 }
 0x507   : > { %v1893_v2 = vmax.f32 %v1819_v59, 0.0 }
 0x508   : > { %v1892_v5 = vmax.f32 %v1814_v63, 0.0  ;;  %v2738_v54 = vpop.f32.mrb[2].mxu1 }
 0x509   : > { %v1915_v57 = vmul.f32 %v3961_v25, %v1893_v2  ;;  %v1829_v49 = vadd.f32 %v2738_v54, %v3957_v58  ;;  %v1823_v7 = vpop.f32.mrb[3].mxu1 }
 0x50a   : > { %v1914_v9 = vmul.f32 %v3961_v25, %v1892_v5  ;;  %v1824_v10 = vadd.f32 %v3957_v58, %v1823_v7 }
 0x50b   : > { %v1895_v11 = vmax.f32 %v1829_v49, 0.0  ;;  %v1937_v0 = vadd.f32 %v3965_v3, %v1915_v57 }
 0x50c   : > { %v1894_v19 = vmax.f32 %v1824_v10, 0.0  ;;  %v2741_v26 = vpop.f32.mrb[4].mxu1  ;;  %v1936_v18 = vadd.f32 %v3965_v3, %v1914_v9 }
 0x50d   : > { %v1917_v27 = vmul.f32 %v3961_v25, %v1895_v11  ;;  %v1839_v12 = vadd.f32 %v2741_v26, %v3957_v58  ;;  %v1833_v13 = vpop.f32.mrb[5].mxu1 }
 0x50e   : > { %v1916_v15 = vmul.f32 %v3961_v25, %v1894_v19  ;;  %v1834_v1 = vadd.f32 %v3957_v58, %v1833_v13  ;;  %2789 = vmatprep.mubr.f32.mxu0 %v1936_v18 }
 0x50f   : > { %v1897_v16 = vmax.f32 %v1839_v12, 0.0  ;;  %2790 = vmatmul.mubr.f32.vlgmr.msra.gmra.mrb[16].mxu0 %v1937_v0  ;;  %v1939_v28 = vadd.f32 %v3965_v3, %v1917_v27 }
 0x510   : > { %v1896_v4 = vmax.f32 %v1834_v1, 0.0  ;;  %v2744_v17 = vpop.f32.mrb[6].mxu1  ;;  %v1938_v36 = vadd.f32 %v3965_v3, %v1916_v15 }
 0x511   : > { %v1919_v37 = vmul.f32 %v3961_v25, %v1897_v16  ;;  %v1849_v55 = vadd.f32 %v2744_v17, %v3957_v58  ;;  %v1843_v29 = vpop.f32.mrb[7].mxu1 }
 0x512   : > { %v1918_v21 = vmul.f32 %v3961_v25, %v1896_v4  ;;  %v1844_v20 = vadd.f32 %v3957_v58, %v1843_v29  ;;  %2792 = vmatprep.mubr.f32.mxu0 %v1938_v36 }
 0x513   : > { %v1899_v39 = vmax.f32 %v1849_v55, 0.0  ;;  %2793 = vmatmul.mubr.f32.gmra.mrb[18].mxu0 %v1939_v28  ;;  %v1941_v40 = vadd.f32 %v3965_v3, %v1919_v37 }
 0x514   : > { %v1898_v41 = vmax.f32 %v1844_v20, 0.0  ;;  %v2747_v42 = vpop.f32.mrb[8].mxu1  ;;  %v1940_v43 = vadd.f32 %v3965_v3, %v1918_v21 }
 0x515   : > { %v1921_v6 = vmul.f32 %v3961_v25, %v1899_v39  ;;  %v1859_v38 = vadd.f32 %v2747_v42, %v3957_v58  ;;  %v1853_v44 = vpop.f32.mrb[9].mxu1 }
 0x516   : > { %v1920_v8 = vmul.f32 %v3961_v25, %v1898_v41  ;;  %v1854_v45 = vadd.f32 %v3957_v58, %v1853_v44  ;;  %2795 = vmatprep.mubr.f32.mxu0 %v1940_v43 }
 0x517   : > { %v1901_v24 = vmax.f32 %v1859_v38, 0.0  ;;  %2796 = vmatmul.mubr.f32.gmra.mrb[20].mxu0 %v1941_v40  ;;  %v1943_v31 = vadd.f32 %v3965_v3, %v1921_v6 }
 0x518   : > { %v1900_v14 = vmax.f32 %v1854_v45, 0.0  ;;  %v2750_v35 = vpop.f32.mrb[10].mxu1  ;;  %v1942_v46 = vadd.f32 %v3965_v3, %v1920_v8 }
 0x519   : > { %v1923_v47 = vmul.f32 %v3961_v25, %v1901_v24  ;;  %v1869_v30 = vadd.f32 %v2750_v35, %v3957_v58  ;;  %v1863_v48 = vpop.f32.mrb[11].mxu1 }
 0x51a   : > { %v1922_v50 = vmul.f32 %v3961_v25, %v1900_v14  ;;  %v1864_v61 = vadd.f32 %v3957_v58, %v1863_v48  ;;  %2798 = vmatprep.mubr.f32.mxu0 %v1942_v46 }
 0x51b   : > { %v1903_v23 = vmax.f32 %v1869_v30, 0.0  ;;  %2799 = vmatmul.mubr.f32.gmra.mrb[22].mxu0 %v1943_v31  ;;  %v1945_v22 = vadd.f32 %v3965_v3, %v1923_v47 }
 0x51c   : > { %v1902_v51 = vmax.f32 %v1864_v61, 0.0  ;;  %v2753_v53 = vpop.f32.mrb[12].mxu1  ;;  %v1944_v34 = vadd.f32 %v3965_v3, %v1922_v50 }
 0x51d   : > { %v1925_v56 = vmul.f32 %v3961_v25, %v1903_v23  ;;  %v1879_v33 = vadd.f32 %v2753_v53, %v3957_v58  ;;  %v1873_v52 = vpop.f32.mrb[13].mxu1 }
 0x51e   : > { %v1924_v32 = vmul.f32 %v3961_v25, %v1902_v51  ;;  %v1874_v60 = vadd.f32 %v3957_v58, %v1873_v52  ;;  %2801 = vmatprep.mubr.f32.mxu0 %v1944_v34 }
 0x51f   : > { %v1905_v59 = vmax.f32 %v1879_v33, 0.0  ;;  %2802 = vmatmul.mubr.f32.gmra.mrb[24].mxu0 %v1945_v22  ;;  %v1947_v62 = vadd.f32 %v3965_v3, %v1925_v56 }
 0x520   : > { %v1904_v63 = vmax.f32 %v1874_v60, 0.0  ;;  %v2756_v2 = vpop.f32.mrb[14].mxu1  ;;  %v1946_v5 = vadd.f32 %v3965_v3, %v1924_v32 }
 0x521   : > { %v1927_v54 = vmul.f32 %v3961_v25, %v1905_v59  ;;  %v1889_v57 = vadd.f32 %v2756_v2, %v3957_v58  ;;  %v1883_v49 = vpop.f32.mrb[15].mxu1 }
 0x522   : > { %v1926_v7 = vmul.f32 %v3961_v25, %v1904_v63  ;;  %v1884_v9 = vadd.f32 %v3957_v58, %v1883_v49  ;;  %2804 = vmatprep.mubr.f32.mxu0 %v1946_v5  ;;  %v2386_v58 = vld [vmem:[%s4185_s10] ss:$0 sm:$0xff] }
 0x523   : > { %v1907_v10 = vmax.f32 %v1889_v57, 0.0  ;;  %2805 = vmatmul.mubr.f32.gmra.mrb[26].mxu0 %v1947_v62  ;;  %v1949_v11 = vadd.f32 %v3965_v3, %v1927_v54 }
 0x524   : > { %v1906_v19 = vmax.f32 %v1884_v9, 0.0  ;;  %v1948_v26 = vadd.f32 %v3965_v3, %v1926_v7 }
 0x525   : > { %v1929_v18 = vmul.f32 %v3961_v25, %v1907_v10 }
 0x526   : > { %v1928_v0 = vmul.f32 %v3961_v25, %v1906_v19  ;;  %2807 = vmatprep.mubr.f32.mxu0 %v1948_v26 }
 0x527   : > { %v1951_v27 = vadd.f32 %v3965_v3, %v1929_v18  ;;  %2808 = vmatmul.mubr.f32.gmra.mrb[28].mxu0 %v1949_v11 }
 0x528   : > { %v1950_v12 = vadd.f32 %v3965_v3, %v1928_v0 }
 0x52a   : > { %2810 = vmatprep.mubr.f32.mxu1 %v1950_v12 }
 0x52b   : > { %2811 = vmatmul.mubr.f32.vlgmr.msra.gmra.mrb[16].mxu1 %v1951_v27 }
 0x5e2   : > { %v2791_v13 = vpop.f32.mrb[16].mxu0 }
 0x5e3   : > { %v4016_v15 = vadd.f32 %v2791_v13, %v2386_v58  ;;  %v2041_v1 = vpop.f32.mrb[17].mxu0 }
 0x5e4   : > { %v4018_v16 = vadd.f32 %v2386_v58, %v2041_v1 }
 0x5e5   : > { %v2121_v25 = vmul.f32 %v4016_v15, %v4016_v15 }
 0x5e6   : > { %v2794_v4 = vpop.f32.mrb[18].mxu0  ;;  %v2120_v55 = vmul.f32 %v4018_v16, %v4018_v16 }
 0x5e7   : > { %v4022_v17 = vadd.f32 %v2794_v4, %v2386_v58  ;;  %2138 = vadd.xlane.f32.xlu0 %v2121_v25  ;;  %v2051_v3 = vpop.f32.mrb[19].mxu0 }
 0x5e8   : > { %v4024_v36 = vadd.f32 %v2386_v58, %v2051_v3 }
 0x5e9   : > { %v2123_v37 = vmul.f32 %v4022_v17, %v4022_v17 }
 0x5ea   : > { %v2797_v29 = vpop.f32.mrb[20].mxu0  ;;  %v2122_v39 = vmul.f32 %v4024_v36, %v4024_v36 }
 0x5eb   : > { %2142 = vadd.xlane.f32.xlu1 %v2123_v37  ;;  %v2061_v28 = vpop.f32.mrb[21].mxu0  ;;  %2136 = vadd.xlane.f32.xlu0 %v2120_v55  ;;  %v4032_v20 = vadd.f32 %v2797_v29, %v2386_v58 }
 0x5ec   : > { %v4030_v21 = vadd.f32 %v2386_v58, %v2061_v28 }
 0x5ed   : > { %v2125_v38 = vmul.f32 %v4032_v20, %v4032_v20 }
 0x5ee   : > { %v2800_v40 = vpop.f32.mrb[22].mxu0  ;;  %v2124_v41 = vmul.f32 %v4030_v21, %v4030_v21 }
 0x5ef   : > { %v2071_v42 = vpop.f32.mrb[23].mxu0  ;;  %2140 = vadd.xlane.f32.xlu1 %v2122_v39  ;;  %v4040_v6 = vadd.f32 %v2800_v40, %v2386_v58 }
 0x5f0   : > { %v4038_v43 = vadd.f32 %v2386_v58, %v2071_v42  ;;  %2144 = vadd.xlane.f32.xlu0 %v2124_v41 }
 0x5f1   : > { %v2127_v14 = vmul.f32 %v4040_v6, %v4040_v6 }
 0x5f2   : > { %v2803_v44 = vpop.f32.mrb[24].mxu0  ;;  %v2126_v8 = vmul.f32 %v4038_v43, %v4038_v43 }
 0x5f3   : > { %v2081_v45 = vpop.f32.mrb[25].mxu0  ;;  %2146 = vadd.xlane.f32.xlu1 %v2125_v38  ;;  %v4048_v31 = vadd.f32 %v2803_v44, %v2386_v58 }
 0x5f4   : > { %v4046_v24 = vadd.f32 %v2386_v58, %v2081_v45  ;;  %2148 = vadd.xlane.f32.xlu0 %v2126_v8 }
 0x5f5   : > { %v2129_v50 = vmul.f32 %v4048_v31, %v4048_v31 }
 0x5f6   : > { %v2806_v35 = vpop.f32.mrb[26].mxu0  ;;  %v2128_v46 = vmul.f32 %v4046_v24, %v4046_v24 }
 0x5f7   : > { %v2091_v47 = vpop.f32.mrb[27].mxu0  ;;  %2150 = vadd.xlane.f32.xlu1 %v2127_v14  ;;  %v4056_v48 = vadd.f32 %v2806_v35, %v2386_v58 }
 0x5f8   : > { %v4054_v30 = vadd.f32 %v2386_v58, %v2091_v47  ;;  %2152 = vadd.xlane.f32.xlu0 %v2128_v46 }
 0x5f9   : > { %v2131_v34 = vmul.f32 %v4056_v48, %v4056_v48 }
 0x5fa   : > { %v2809_v61 = vpop.f32.mrb[28].mxu0  ;;  %v2130_v23 = vmul.f32 %v4054_v30, %v4054_v30 }
 0x5fb   : > { %v2101_v22 = vpop.f32.mrb[29].mxu0  ;;  %2154 = vadd.xlane.f32.xlu1 %v2129_v50  ;;  %v4064_v53 = vadd.f32 %v2809_v61, %v2386_v58 }
 0x5fc   : > { %v4062_v51 = vadd.f32 %v2386_v58, %v2101_v22  ;;  %2156 = vadd.xlane.f32.xlu0 %v2130_v23 }
 0x5fd   : > { %v2133_v59 = vmul.f32 %v4064_v53, %v4064_v53 }
 0x5fe   : > { %v2812_v56 = vpop.f32.mrb[16].mxu1  ;;  %v2132_v33 = vmul.f32 %v4062_v51, %v4062_v51 }
 0x5ff   : > { %v2111_v52 = vpop.f32.mrb[17].mxu1  ;;  %2158 = vadd.xlane.f32.xlu1 %v2131_v34  ;;  %v4072_v60 = vadd.f32 %v2812_v56, %v2386_v58 }
 0x600   : > { %v4070_v32 = vadd.f32 %v2386_v58, %v2111_v52  ;;  %2160 = vadd.xlane.f32.xlu0 %v2132_v33 }
 0x601   : > { %v2135_v63 = vmul.f32 %v4072_v60, %v4072_v60 }
 0x602   : > { %v2134_v62 = vmul.f32 %v4070_v32, %v4070_v32 }
 0x603   : > { %2162 = vadd.xlane.f32.xlu1 %v2133_v59 }
 0x604   : > { %2164 = vadd.xlane.f32.xlu0 %v2134_v62 }
 0x607   : > { %2166 = vadd.xlane.f32.xlu1 %v2135_v63 }
 0x674   : > { %v2139_v2 = vpop.xlane.xlu0 %2138 }
 0x675   : > { %v2169_v5 = vmax.f32 %v2139_v2, 1e-24 }
 0x677   : > { %3050 = vrsqrt.f32 %v2169_v5 }
 0x678   : > { %v2143_v54 = vpop.xlane.xlu1 %2142  ;;  %v2137_v57 = vpop.xlane.xlu0 %2136 }
 0x679   : > { %v2171_v49 = vmax.f32 %v2143_v54, 1e-24  ;;  %v2168_v7 = vmax.f32 %v2137_v57, 1e-24 }
 0x67b   : > { %3052 = vrsqrt.f32 %v2171_v49 }
 0x67c   : > { %3054 = vrsqrt.f32 %v2168_v7  ;;  %v2141_v9 = vpop.xlane.xlu1 %2140 }
 0x67d   : > { %v2170_v10 = vmax.f32 %v2141_v9, 1e-24  ;;  %v2145_v11 = vpop.xlane.xlu0 %2144 }
 0x67e   : > { %v2172_v19 = vmax.f32 %v2145_v11, 1e-24 }
 0x67f   : > { %3056 = vrsqrt.f32 %v2170_v10 }
 0x680   : > { %3058 = vrsqrt.f32 %v2172_v19  ;;  %v2147_v26 = vpop.xlane.xlu1 %2146 }
 0x681   : > { %v3051_v18 = vpop.eup %3050  ;;  %v2173_v0 = vmax.f32 %v2147_v26, 1e-24  ;;  %v2149_v27 = vpop.xlane.xlu0 %2148 }
 0x682   : > { %v2201_v12 = vmul.f32 %v3051_v18, %v4016_v15  ;;  %v2174_v58 = vmax.f32 %v2149_v27, 1e-24 }
 0x683   : > { %3060 = vrsqrt.f32 %v2173_v0 }
 0x684   : > { %2217 = vst [vmem:[%s3391_s15 + $0x8] sm:$0xff] %v2201_v12  ;;  %3062 = vrsqrt.f32 %v2174_v58  ;;  %v2151_v13 = vpop.xlane.xlu1 %2150 }
 0x685   : > { %v3053_v1 = vpop.eup %3052  ;;  %v2175_v25 = vmax.f32 %v2151_v13, 1e-24  ;;  %v2153_v4 = vpop.xlane.xlu0 %2152 }
 0x686   : > { %v3055_v3 = vpop.eup %3054  ;;  %v2203_v37 = vmul.f32 %v3053_v1, %v4022_v17  ;;  %v2176_v55 = vmax.f32 %v2153_v4, 1e-24 }
 0x687   : > { %v2200_v29 = vmul.f32 %v3055_v3, %v4018_v16  ;;  %3064 = vrsqrt.f32 %v2175_v25 }
 0x688   : > { %2219 = vst [vmem:[%s3391_s15 + $0x18] sm:$0xff] %v2203_v37  ;;  %3066 = vrsqrt.f32 %v2176_v55  ;;  %v2155_v15 = vpop.xlane.xlu1 %2154 }
 0x689   : > { %v3057_v28 = vpop.eup %3056  ;;  %2216 = vst [vmem:[%s3391_s15] sm:$0xff] %v2200_v29  ;;  %v2177_v39 = vmax.f32 %v2155_v15, 1e-24  ;;  %v2157_v40 = vpop.xlane.xlu0 %2156 }
 0x68a   : > { %v3059_v41 = vpop.eup %3058  ;;  %v2202_v42 = vmul.f32 %v3057_v28, %v4024_v36  ;;  %v2178_v38 = vmax.f32 %v2157_v40, 1e-24 }
 0x68b   : > { %v2204_v17 = vmul.f32 %v3059_v41, %v4030_v21  ;;  %3068 = vrsqrt.f32 %v2177_v39 }
 0x68c   : > { %2218 = vst [vmem:[%s3391_s15 + $0x10] sm:$0xff] %v2202_v42  ;;  %3070 = vrsqrt.f32 %v2178_v38  ;;  %v2159_v16 = vpop.xlane.xlu1 %2158 }
 0x68d   : > { %v3061_v44 = vpop.eup %3060  ;;  %2220 = vst [vmem:[%s3391_s15 + $0x20] sm:$0xff] %v2204_v17  ;;  %v2179_v8 = vmax.f32 %v2159_v16, 1e-24  ;;  %v2161_v45 = vpop.xlane.xlu0 %2160 }
 0x68e   : > { %v3063_v14 = vpop.eup %3062  ;;  %v2205_v35 = vmul.f32 %v3061_v44, %v4032_v20  ;;  %v2180_v46 = vmax.f32 %v2161_v45, 1e-24 }
 0x68f   : > { %v2206_v36 = vmul.f32 %v3063_v14, %v4038_v43  ;;  %3072 = vrsqrt.f32 %v2179_v8 }
 0x690   : > { %2221 = vst [vmem:[%s3391_s15 + $0x28] sm:$0xff] %v2205_v35  ;;  %3074 = vrsqrt.f32 %v2180_v46  ;;  %v2163_v21 = vpop.xlane.xlu1 %2162 }
 0x691   : > { %v3065_v47 = vpop.eup %3064  ;;  %2222 = vst [vmem:[%s3391_s15 + $0x30] sm:$0xff] %v2206_v36  ;;  %v2181_v50 = vmax.f32 %v2163_v21, 1e-24  ;;  %v2165_v61 = vpop.xlane.xlu0 %2164 }
 0x692   : > { %v3067_v23 = vpop.eup %3066  ;;  %v2207_v22 = vmul.f32 %v3065_v47, %v4040_v6  ;;  %v2182_v34 = vmax.f32 %v2165_v61, 1e-24 }
 0x693   : > { %v2208_v20 = vmul.f32 %v3067_v23, %v4046_v24  ;;  %3076 = vrsqrt.f32 %v2181_v50 }
 0x694   : > { %2223 = vst [vmem:[%s3391_s15 + $0x38] sm:$0xff] %v2207_v22  ;;  %3078 = vrsqrt.f32 %v2182_v34  ;;  %v2167_v43 = vpop.xlane.xlu1 %2166 }
 0x695   : > { %v3069_v56 = vpop.eup %3068  ;;  %2224 = vst [vmem:[%s3391_s15 + $0x40] sm:$0xff] %v2208_v20  ;;  %v2183_v33 = vmax.f32 %v2167_v43, 1e-24 }
 0x696   : > { %v3071_v52 = vpop.eup %3070  ;;  %v2209_v59 = vmul.f32 %v3069_v56, %v4048_v31 }
 0x697   : > { %v2210_v62 = vmul.f32 %v3071_v52, %v4054_v30  ;;  %3080 = vrsqrt.f32 %v2183_v33 }
 0x698   : > { %2225 = vst [vmem:[%s3391_s15 + $0x48] sm:$0xff] %v2209_v59 }
 0x699   : > { %v3073_v6 = vpop.eup %3072  ;;  %2226 = vst [vmem:[%s3391_s15 + $0x50] sm:$0xff] %v2210_v62 }
 0x69a   : > { %v3075_v24 = vpop.eup %3074  ;;  %v2211_v63 = vmul.f32 %v3073_v6, %v4056_v48 }
 0x69b   : > { %v2212_v2 = vmul.f32 %v3075_v24, %v4062_v51 }
 0x69c   : > { %2227 = vst [vmem:[%s3391_s15 + $0x58] sm:$0xff] %v2211_v63 }
 0x69d   : > { %v3077_v5 = vpop.eup %3076  ;;  %2228 = vst [vmem:[%s3391_s15 + $0x60] sm:$0xff] %v2212_v2 }
 0x69e   : > { %v3079_v54 = vpop.eup %3078  ;;  %v2213_v57 = vmul.f32 %v3077_v5, %v4064_v53 }
 0x69f   : > { %v2214_v31 = vmul.f32 %v3079_v54, %v4070_v32 }
 0x6a0   : > { %2229 = vst [vmem:[%s3391_s15 + $0x68] sm:$0xff] %v2213_v57 }
 0x6a1   : > { %v3081_v30 = vpop.eup %3080  ;;  %2230 = vst [vmem:[%s3391_s15 + $0x70] sm:$0xff] %v2214_v31 }
 0x6a2   : > { %v2215_v49 = vmul.f32 %v3081_v30, %v4072_v60 }
 0x6a4   : > { %2231 = vst [vmem:[%s3391_s15 + $0x78] sm:$0xff] %v2215_v49 }
 0x6a5 PF: > { %s2392_s27 = sshll.u32 %s3160_s20, 11  ;;  %s2246_s26 = sshll.u32 %s3391_s15, 4  ;;  %s4119_s26 = int_to_ptr.vmem [resolvable:$true] %s2246_s26 }
 0x6a6   : > { %s4116_s29 = scalar_lea.hbm %s4186_s11, %s2392_s27  ;;  %s4199_s30 = sand.u32 1, %s3152_s18  }
 0x6a7   : > { %s4123_s25 = scalar_lea.sflag [#allocation7], %s4199_s30  ;;  %s3082_s0 = scalar_lea.vmem %s4119_s26, 2048 }
 0x6a8   : > { %p3083_p5 = scmp.ne.s32.totalorder %s4119_s26, %s3082_s0  ;;  %s3180_s20 = smov [#allocation6]  }
 0x6a9   : > { %s3086_s23 = sshll.u32 %s3180_s20, 4  ;;  %s3087_s23 = int_to_ptr.vmem [resolvable:$false] %s3086_s23 }
 0x6aa   : > { %p3084_p6 = pnand %p3083_p5, %p3295_p3  ;;  %s3088_s21 = scalar_lea.vmem %s3087_s23, 4096 }
 0x6ab   : > { %p3089_p9 = scmp.lt.s32.totalorder %s4119_s26, %s3087_s23  ;;  %p3090_p10 = scmp.lt.s32.totalorder %s3088_s21, %s3082_s0 }
 0x6ac   : > { %p3085_p7 = pneg %p3084_p6 }
 0x6ad   : > { %p3091_p11 = por %p3090_p10, %p3089_p9 }
 0x6af   : > { %p3092_p12 = pnand %p3091_p11, %p3085_p7 }
 0x6b1   : > { %3095 = shalt.err (!%p3092_p12)
}
 0x6b2   : > { %s3096_s15 = scalar_lea.hbm %s4116_s29, 2048  ;;  %s3100_s16 = scalar_lea.hbm %s4186_s11, 4096 }
 0x6b3   : > { %p3097_p13 = scmp.ne.s32.totalorder %s4116_s29, %s3096_s15  ;;  %p3101_p2 = scmp.lt.u32.totalorder %s4116_s29, %s4186_s11 }
 0x6b4   : > { %p3102_p4 = scmp.lt.u32.totalorder %s3100_s16, %s3096_s15  ;;  %p3104_p6 = scmp.lt.u32.totalorder %s3096_s15, %s4116_s29 }
 0x6b5   : > { %p3098_p0 = pnand %p3097_p13, %p3295_p3 }
 0x6b6   : > { %p3103_p5 = por %p3102_p4, %p3101_p2 }
 0x6b7   : > { %p3099_p1 = pneg %p3098_p0 }
 0x6b8   : > { %p3105_p7 = por %p3104_p6, %p3103_p5 }
 0x6ba   : > { %p3106_p9 = pnand %p3105_p7, %p3099_p1 }
 0x6bc   : > { %3109 = shalt.err (!%p3106_p9)
}
 0x6bd   : > { %s3181_s0 = smov 128   ;;  %s3182_s23 = smov 8  }
 0x6be   : > { %2969 = dma.vmem_to_hbm [thread:$0]  (%p3295_p3), %s4119_s26, 2048, %s4116_s29, %s4123_s25, %s3181_s0, %s3181_s0, %s3182_s23  }
 0x6bf PF: > { %p2975_p10 = scmp.ge.s32.totalorder %s3176_s24, 2  ;;  %s2261_s21 = sand.u32 1, %s3148_s17  }
 0x6c0   : > { %s2262_s15 = scalar_lea.sflag [#allocation7], %s2261_s21 }
 0x6c1   : > { %p2972_p11 = pnand %p2975_p10, %p3306_p8 }
 0x6c3   : > { %3143 = dma.done.wait (!%p2972_p11), %s2262_s15, 2048  }
 0x6c4   : > { %3145 = vsyncadd (!%p2972_p11), %s2262_s15, 4294965248  ;;  %s24_s24 = sadd.s32 1, %s3176_s24   ;;  %s4200_s21 = sld [smem:[#allocation9_spill]] }
 0x6c5   : > { %p21_p12 = scmp.ge.s32.totalorder %s24_s24, 8   ;;  %s4201_s12 = sld [smem:[#allocation10_spill]] }
 0x6c6   : > { %s4202_s23 = sld [smem:[#allocation11_spill]]  ;;  %s4203_s17 = smov %s3152_s18 }
 0x6c7   : > { %s4204_s18 = smov %s3156_s19  ;;  %s4205_s19 = smov %s3304_s13 }
 0x6c8   : > { %s4206_s20 = smov %s3168_s22  ;;  %23 = sbr.rel (!%p21_p12) target bundleno = 7 (0x7), region = 119 }
 0x6cb   : > { %s4207_s22 = smov %s4201_s12 }
 0x6cf   :  { %2267 = vsyncpa [#allocation7], 1 }
 0x6d0   :  { %2269 = vsyncpa [#allocation7 + $0x1], 1 }

</bundles_post_ra>
